<compile_context>
chip_gen: v7x
topology: tpu7x:2x2x1
jax: 0.10.0
libtpu: 0.0.40
codegen_flags: <defaults>
</compile_context>

<pallas_src>
import functools

import numpy as np
import jax
import jax.numpy as jnp
from jax.experimental import pallas as pl
from jax.experimental.pallas import tpu as pltpu

CLASSES = 10
HIDDEN = 128                       # hard-coded hidden width in SAGE.__init__
LANE = 128                         # TPU lane width
VMEM_LIMIT = 32 * 1024 * 1024


def _round_up(x, m):
    return (x + m - 1) // m * m


# ---------------------------------------------------------------------------
# Pallas kernel: fused linear (+bias, optional ReLU) over a row tile.
#   - x tile (TR, K) f32 is cast to bf16 right before the MXU matmul,
#   - weights are stored bf16, accumulation is f32,
#   - output lane dim is always a multiple of 128 -> dense (unmasked) stores.
# ---------------------------------------------------------------------------
def linear_kernel(x_ref, w_ref, b_ref, o_ref, *, apply_relu):
    z = jnp.dot(x_ref[...].astype(jnp.bfloat16), w_ref[...],
                preferred_element_type=jnp.float32) + b_ref[...]
    if apply_relu:
        z = jnp.maximum(z, 0.0)
    o_ref[...] = z


def pallas_linear(x, w, b, *, apply_relu=False, block_rows=256):
    """y = x @ w + b (optionally ReLU), row-tiled Pallas kernel."""
    R, K = x.shape
    Kw, D = w.shape
    assert K == Kw, (K, Kw)
    assert b.shape == (1, D)
    assert D % LANE == 0, "output lane dim must be padded to a multiple of 128"

    tr = min(block_rows, _round_up(R, 8))          # row tile, multiple of 8
    Rp = _round_up(R, tr)
    if Rp != R:
        x = jnp.pad(x, ((0, Rp - R), (0, 0)))

    # Crude VMEM budget check (double-buffered blocks).
    est = 2 * (tr * K * 4 + Kw * D * 2 + D * 4 + tr * D * 4)
    assert est < VMEM_LIMIT, f"tile plan needs ~{est} B VMEM > {VMEM_LIMIT} B"

    out = pl.pallas_call(
        functools.partial(linear_kernel, apply_relu=apply_relu),
        grid=(Rp // tr,),
        in_specs=[
            pl.BlockSpec((tr, K), lambda i: (i, 0)),    # row tile of x
            pl.BlockSpec((Kw, D), lambda i: (0, 0)),    # weights stay resident
            pl.BlockSpec((1, D), lambda i: (0, 0)),     # bias stays resident
        ],
        out_specs=pl.BlockSpec((tr, D), lambda i: (i, 0)),
        out_shape=jax.ShapeDtypeStruct((Rp, D), jnp.float32),
        compiler_params=pltpu.CompilerParams(
            dimension_semantics=("parallel",),
            vmem_limit_bytes=VMEM_LIMIT,
        ),
    )(x, w, b)
    return out[:R] if Rp != R else out


# ---------------------------------------------------------------------------
# Parameter init (PyTorch nn.Linear-style uniform bounds), packed for the
# kernels: merged concat weights, transposed to (K, Dout), zero-padded columns
# so every kernel output is 128-lane dense, stored in bf16.
# ---------------------------------------------------------------------------
def _linear_params(key, in_features, out_features):
    kw, kb = jax.random.split(key)
    bound = 1.0 / np.sqrt(float(in_features))
    w = jax.random.uniform(kw, (out_features, in_features), jnp.float32,
                           minval=-bound, maxval=bound)
    b = jax.random.uniform(kb, (out_features,), jnp.float32,
                           minval=-bound, maxval=bound)
    return w, b


def _pack_weight(w_t, in_segments, out_pad):
    """w_t: (K_real, Dout).  in_segments: [(real_width, padded_width), ...]
    describing the concatenated input layout; rows for padded (always-zero)
    input columns are zero.  Output columns zero-padded to out_pad."""
    rows, r = [], 0
    for real, padded in in_segments:
        seg = w_t[r:r + real]
        r += real
        if padded > real:
            seg = jnp.pad(seg, ((0, padded - real), (0, 0)))
        rows.append(seg)
    w = jnp.concatenate(rows, axis=0) if len(rows) > 1 else rows[0]
    if out_pad > w.shape[1]:
        w = jnp.pad(w, ((0, 0), (0, out_pad - w.shape[1])))
    return w.astype(jnp.bfloat16)


def _pack_bias(b, out_pad):
    return jnp.pad(b, (0, out_pad - b.shape[0]))[None, :].astype(jnp.float32)


def init_model_params(key, ndim_in, ndim_out, edim):
    k = jax.random.split(key, 5)
    out_pad = _round_up(ndim_out, LANE)
    cls_pad = _round_up(CLASSES, LANE)

    # Layer 1: W_msg(ndim_in+edim -> 128), W_apply(ndim_in+128 -> 128)
    wm1, bm1 = _linear_params(k[0], ndim_in + edim, HIDDEN)
    wa1, ba1 = _linear_params(k[1], ndim_in + HIDDEN, HIDDEN)
    layer1 = dict(
        wm=_pack_weight(wm1.T, [(ndim_in + edim, ndim_in + edim)], HIDDEN),
        bm=_pack_bias(bm1, HIDDEN),
        wa=_pack_weight(wa1.T, [(ndim_in + HIDDEN, ndim_in + HIDDEN)], HIDDEN),
        ba=_pack_bias(ba1, HIDDEN))

    # Layer 2: W_msg(128+edim -> ndim_out), W_apply(128+ndim_out -> ndim_out)
    wm2, bm2 = _linear_params(k[2], HIDDEN + edim, ndim_out)
    wa2, ba2 = _linear_params(k[3], HIDDEN + ndim_out, ndim_out)
    layer2 = dict(
        wm=_pack_weight(wm2.T, [(HIDDEN + edim, HIDDEN + edim)], out_pad),
        bm=_pack_bias(bm2, out_pad),
        wa=_pack_weight(wa2.T, [(HIDDEN, HIDDEN), (ndim_out, out_pad)], out_pad),
        ba=_pack_bias(ba2, out_pad))

    # Edge predictor: W(2*ndim_out -> CLASSES), inputs are the 128-padded h.
    wp, bp = _linear_params(k[4], 2 * ndim_out, CLASSES)
    pred = dict(
        w=_pack_weight(wp.T, [(ndim_out, out_pad), (ndim_out, out_pad)], cls_pad),
        b=_pack_bias(bp, cls_pad))
    return dict(layers=[layer1, layer2], pred=pred)


# ---------------------------------------------------------------------------
# Graph structure precompute (once, at graph-construction time).
# ---------------------------------------------------------------------------
def build_graph_structure(dst, num_nodes):
    deg = np.zeros((num_nodes,), np.float32)
    np.add.at(deg, np.asarray(dst), 1.0)
    inv = 1.0 / np.maximum(deg, 1.0)          # zero-in-degree -> h_neigh = 0
    return jnp.asarray(inv).reshape(num_nodes, 1)


# ---------------------------------------------------------------------------
# Model forward: dense math in Pallas kernels, sparse graph plumbing in glue.
# ---------------------------------------------------------------------------
@jax.jit
def model_forward(params, src, dst, inv_deg, nfeats, efeats):
    N = nfeats.shape[0]
    h = nfeats[:, 0, :]          # (N, ndim_in)  middle dim is 1
    ef = efeats[:, 0, :]         # (E, edim)

    for lp in params['layers']:
        # TODO(synk): nn.Dropout before layer 2 treated as identity (eval mode).
        xe = jnp.concatenate([jnp.take(h, src, axis=0), ef], axis=1)
        m = pallas_linear(xe, lp['wm'], lp['bm'], apply_relu=False)   # (E, Dp)
        # Edge-indexed mean aggregation (O(E*D)): segment-sum by dst, scale by
        # precomputed 1/in-degree.  Replaces the old dense (N, E) matmul.
        # TODO(synk): scatter-add kept in XLA glue; an in-kernel VMEM scatter
        # needs dynamic sublane-indexed stores that are not portably supported.
        h_sum = jnp.zeros((N, m.shape[1]), jnp.float32).at[dst].add(m)
        h_neigh = h_sum * inv_deg
        xa = jnp.concatenate([h, h_neigh], axis=1)
        h = pallas_linear(xa, lp['wa'], lp['ba'], apply_relu=True)    # (N, Dp)

    # SAGE.forward(): nfeats.sum(1) -- middle dim is 1, already squeezed.
    # MLPPredictor: score = [h_u | h_v] @ W + b per edge (lane-padded output).
    xp = jnp.concatenate([jnp.take(h, src, axis=0),
                          jnp.take(h, dst, axis=0)], axis=1)
    score = pallas_linear(xp, params['pred']['w'], params['pred']['b'],
                          apply_relu=False)
    return score[:, :CLASSES]


# Pure-JAX reference (same packed bf16 weights) for a sanity check.
def reference_forward(params, src, dst, inv_deg, nfeats, efeats):
    h = nfeats[:, 0, :]
    ef = efeats[:, 0, :]
    N = h.shape[0]

    def lin(x, w, b, relu):
        z = jnp.dot(x.astype(jnp.bfloat16), w,
                    preferred_element_type=jnp.float32) + b
        return jnp.maximum(z, 0.0) if relu else z

    for lp in params['layers']:
        xe = jnp.concatenate([h[src], ef], axis=1)
        m = lin(xe, lp['wm'], lp['bm'], False)
        h_neigh = jnp.zeros((N, m.shape[1]), jnp.float32).at[dst].add(m) * inv_deg
        xa = jnp.concatenate([h, h_neigh], axis=1)
        h = lin(xa, lp['wa'], lp['ba'], True)
    xp = jnp.concatenate([h[src], h[dst]], axis=1)
    return lin(xp, params['pred']['w'], params['pred']['b'], False)[:, :CLASSES]


# ---------------------------------------------------------------------------
if __name__ == "__main__":
    # small, deterministic problem
    N = 256          # nodes
    E = 1024         # edges
    ndim_in = 16
    edim = 8
    ndim_out = 32

    key = jax.random.PRNGKey(0)
    k_param, k_n, k_e = jax.random.split(key, 3)

    params = init_model_params(k_param, ndim_in, ndim_out, edim)

    # deterministic graph connectivity (edge u -> v)
    src = jnp.arange(E, dtype=jnp.int32) % N
    dst = (3 * jnp.arange(E, dtype=jnp.int32) + 7) % N
    inv_deg = build_graph_structure(dst, N)        # precomputed once

    nfeats = jax.random.normal(k_n, (N, 1, ndim_in), jnp.float32)
    efeats = jax.random.normal(k_e, (E, 1, edim), jnp.float32)

    scores = model_forward(params, src, dst, inv_deg, nfeats, efeats)
    scores = jax.block_until_ready(scores)

    assert scores.shape == (E, CLASSES) and scores.dtype == jnp.float32
    ref = reference_forward(params, src, dst, inv_deg, nfeats, efeats)
    np.testing.assert_allclose(np.asarray(scores), np.asarray(ref),
                               rtol=5e-2, atol=5e-2)
    print("KERNEL_OK")
</pallas_src>

<mosaic_0001>
module attributes {stable_mosaic.version = 11 : i64} {
  func.func @linear_kernel(%arg0: i32, %arg1: memref<256x24xf32, #tpu.memory_space<vmem>>, %arg2: memref<24x128xbf16, #tpu.memory_space<vmem>>, %arg3: memref<1x128xf32, #tpu.memory_space<vmem>>, %arg4: memref<256x128xf32, #tpu.memory_space<vmem>>) attributes {dimension_semantics = [#tpu.dimension_semantics<parallel>], iteration_bounds = array<i64: 4>, scalar_prefetch = 0 : i64, scratch_operands = 0 : i64, tpu.core_type = #tpu.core_type<tc>, window_params = [{transform_indices = @transform_0, window_bounds = array<i64: 256, 24>}, {pipeline_mode = #tpu.pipeline_mode<synchronous>, transform_indices = @transform_1, window_bounds = array<i64: 24, 128>}, {pipeline_mode = #tpu.pipeline_mode<synchronous>, transform_indices = @transform_2, window_bounds = array<i64: 1, 128>}, {transform_indices = @transform_3, window_bounds = array<i64: 256, 128>}]} {
    %c0 = arith.constant 0 : index
    %c0_0 = arith.constant 0 : index
    %0 = vector.load %arg1[%c0, %c0_0] : memref<256x24xf32, #tpu.memory_space<vmem>>, vector<256x24xf32>
    %1 = arith.truncf %0 : vector<256x24xf32> to vector<256x24xbf16>
    %c0_1 = arith.constant 0 : index
    %c0_2 = arith.constant 0 : index
    %2 = vector.load %arg2[%c0_1, %c0_2] : memref<24x128xbf16, #tpu.memory_space<vmem>>, vector<24x128xbf16>
    %cst = arith.constant dense<0.000000e+00> : vector<256x128xf32>
    %3 = tpu.matmul %1, %2, %cst {dimension_numbers = #tpu.dot_dimension_numbers<[1], [0], [0], [1], [0, 0, 1, 1], [], []>} : vector<256x24xbf16>, vector<24x128xbf16>, vector<256x128xf32> -> vector<256x128xf32>
    %c0_3 = arith.constant 0 : index
    %c0_4 = arith.constant 0 : index
    %4 = vector.load %arg3[%c0_3, %c0_4] : memref<1x128xf32, #tpu.memory_space<vmem>>, vector<1x128xf32>
    %5 = vector.broadcast %4 : vector<1x128xf32> to vector<256x128xf32>
    %6 = arith.addf %3, %5 : vector<256x128xf32>
    %c0_5 = arith.constant 0 : index
    %c0_6 = arith.constant 0 : index
    %7 = vector.load %arg4[%c0_5, %c0_6] : memref<256x128xf32, #tpu.memory_space<vmem>>, vector<256x128xf32>
    tpu.vector_store %arg4[%c0_5, %c0_6], %6 {strides = array<i32>} : memref<256x128xf32, #tpu.memory_space<vmem>>, vector<256x128xf32>,
    return
  }
  func.func @transform_0(%arg0: i32) -> (i32, i32) {
    %c0_i32 = arith.constant 0 : i32
    %c0_i32_0 = arith.constant 0 : i32
    return %arg0, %c0_i32 : i32, i32
  }
  func.func @transform_1(%arg0: i32) -> (i32, i32) {
    %c0_i32 = arith.constant 0 : i32
    %c0_i32_0 = arith.constant 0 : i32
    %c0_i32_1 = arith.constant 0 : i32
    return %c0_i32, %c0_i32_0 : i32, i32
  }
  func.func @transform_2(%arg0: i32) -> (i32, i32) {
    %c0_i32 = arith.constant 0 : i32
    %c0_i32_0 = arith.constant 0 : i32
    %c0_i32_1 = arith.constant 0 : i32
    return %c0_i32, %c0_i32_0 : i32, i32
  }
  func.func @transform_3(%arg0: i32) -> (i32, i32) {
    %c0_i32 = arith.constant 0 : i32
    %c0_i32_0 = arith.constant 0 : i32
    return %arg0, %c0_i32 : i32, i32
  }
}

module attributes {stable_mosaic.version = 11 : i64} {
  func.func @linear_kernel(%arg0: i32, %arg1: memref<256x144xf32, #tpu.memory_space<vmem>>, %arg2: memref<144x128xbf16, #tpu.memory_space<vmem>>, %arg3: memref<1x128xf32, #tpu.memory_space<vmem>>, %arg4: memref<256x128xf32, #tpu.memory_space<vmem>>) attributes {dimension_semantics = [#tpu.dimension_semantics<parallel>], iteration_bounds = array<i64: 1>, scalar_prefetch = 0 : i64, scratch_operands = 0 : i64, tpu.core_type = #tpu.core_type<tc>, window_params = [{transform_indices = @transform_0, window_bounds = array<i64: 256, 144>}, {pipeline_mode = #tpu.pipeline_mode<synchronous>, transform_indices = @transform_1, window_bounds = array<i64: 144, 128>}, {pipeline_mode = #tpu.pipeline_mode<synchronous>, transform_indices = @transform_2, window_bounds = array<i64: 1, 128>}, {transform_indices = @transform_3, window_bounds = array<i64: 256, 128>}]} {
    %c0 = arith.constant 0 : index
    %c0_0 = arith.constant 0 : index
    %0 = vector.load %arg1[%c0, %c0_0] : memref<256x144xf32, #tpu.memory_space<vmem>>, vector<256x144xf32>
    %1 = arith.truncf %0 : vector<256x144xf32> to vector<256x144xbf16>
    %c0_1 = arith.constant 0 : index
    %c0_2 = arith.constant 0 : index
    %2 = vector.load %arg2[%c0_1, %c0_2] : memref<144x128xbf16, #tpu.memory_space<vmem>>, vector<144x128xbf16>
    %cst = arith.constant dense<0.000000e+00> : vector<256x128xf32>
    %3 = tpu.matmul %1, %2, %cst {dimension_numbers = #tpu.dot_dimension_numbers<[1], [0], [0], [1], [0, 0, 1, 1], [], []>} : vector<256x144xbf16>, vector<144x128xbf16>, vector<256x128xf32> -> vector<256x128xf32>
    %c0_3 = arith.constant 0 : index
    %c0_4 = arith.constant 0 : index
    %4 = vector.load %arg3[%c0_3, %c0_4] : memref<1x128xf32, #tpu.memory_space<vmem>>, vector<1x128xf32>
    %5 = vector.broadcast %4 : vector<1x128xf32> to vector<256x128xf32>
    %6 = arith.addf %3, %5 : vector<256x128xf32>
    %cst_5 = arith.constant 0.000000e+00 : f32
    %7 = vector.broadcast %cst_5 : f32 to vector<256x128xf32>
    %8 = arith.maximumf %6, %7 : vector<256x128xf32>
    %c0_6 = arith.constant 0 : index
    %c0_7 = arith.constant 0 : index
    %9 = vector.load %arg4[%c0_6, %c0_7] : memref<256x128xf32, #tpu.memory_space<vmem>>, vector<256x128xf32>
    tpu.vector_store %arg4[%c0_6, %c0_7], %8 {strides = array<i32>} : memref<256x128xf32, #tpu.memory_space<vmem>>, vector<256x128xf32>,
    return
  }
  func.func @transform_0(%arg0: i32) -> (i32, i32) {
    %c0_i32 = arith.constant 0 : i32
    %c0_i32_0 = arith.constant 0 : i32
    return %arg0, %c0_i32 : i32, i32
  }
  func.func @transform_1(%arg0: i32) -> (i32, i32) {
    %c0_i32 = arith.constant 0 : i32
    %c0_i32_0 = arith.constant 0 : i32
    %c0_i32_1 = arith.constant 0 : i32
    return %c0_i32, %c0_i32_0 : i32, i32
  }
  func.func @transform_2(%arg0: i32) -> (i32, i32) {
    %c0_i32 = arith.constant 0 : i32
    %c0_i32_0 = arith.constant 0 : i32
    %c0_i32_1 = arith.constant 0 : i32
    return %c0_i32, %c0_i32_0 : i32, i32
  }
  func.func @transform_3(%arg0: i32) -> (i32, i32) {
    %c0_i32 = arith.constant 0 : i32
    %c0_i32_0 = arith.constant 0 : i32
    return %arg0, %c0_i32 : i32, i32
  }
}

module attributes {stable_mosaic.version = 11 : i64} {
  func.func @linear_kernel(%arg0: i32, %arg1: memref<256x136xf32, #tpu.memory_space<vmem>>, %arg2: memref<136x128xbf16, #tpu.memory_space<vmem>>, %arg3: memref<1x128xf32, #tpu.memory_space<vmem>>, %arg4: memref<256x128xf32, #tpu.memory_space<vmem>>) attributes {dimension_semantics = [#tpu.dimension_semantics<parallel>], iteration_bounds = array<i64: 4>, scalar_prefetch = 0 : i64, scratch_operands = 0 : i64, tpu.core_type = #tpu.core_type<tc>, window_params = [{transform_indices = @transform_0, window_bounds = array<i64: 256, 136>}, {pipeline_mode = #tpu.pipeline_mode<synchronous>, transform_indices = @transform_1, window_bounds = array<i64: 136, 128>}, {pipeline_mode = #tpu.pipeline_mode<synchronous>, transform_indices = @transform_2, window_bounds = array<i64: 1, 128>}, {transform_indices = @transform_3, window_bounds = array<i64: 256, 128>}]} {
    %c0 = arith.constant 0 : index
    %c0_0 = arith.constant 0 : index
    %0 = vector.load %arg1[%c0, %c0_0] : memref<256x136xf32, #tpu.memory_space<vmem>>, vector<256x136xf32>
    %1 = arith.truncf %0 : vector<256x136xf32> to vector<256x136xbf16>
    %c0_1 = arith.constant 0 : index
    %c0_2 = arith.constant 0 : index
    %2 = vector.load %arg2[%c0_1, %c0_2] : memref<136x128xbf16, #tpu.memory_space<vmem>>, vector<136x128xbf16>
    %cst = arith.constant dense<0.000000e+00> : vector<256x128xf32>
    %3 = tpu.matmul %1, %2, %cst {dimension_numbers = #tpu.dot_dimension_numbers<[1], [0], [0], [1], [0, 0, 1, 1], [], []>} : vector<256x136xbf16>, vector<136x128xbf16>, vector<256x128xf32> -> vector<256x128xf32>
    %c0_3 = arith.constant 0 : index
    %c0_4 = arith.constant 0 : index
    %4 = vector.load %arg3[%c0_3, %c0_4] : memref<1x128xf32, #tpu.memory_space<vmem>>, vector<1x128xf32>
    %5 = vector.broadcast %4 : vector<1x128xf32> to vector<256x128xf32>
    %6 = arith.addf %3, %5 : vector<256x128xf32>
    %c0_5 = arith.constant 0 : index
    %c0_6 = arith.constant 0 : index
    %7 = vector.load %arg4[%c0_5, %c0_6] : memref<256x128xf32, #tpu.memory_space<vmem>>, vector<256x128xf32>
    tpu.vector_store %arg4[%c0_5, %c0_6], %6 {strides = array<i32>} : memref<256x128xf32, #tpu.memory_space<vmem>>, vector<256x128xf32>,
    return
  }
  func.func @transform_0(%arg0: i32) -> (i32, i32) {
    %c0_i32 = arith.constant 0 : i32
    %c0_i32_0 = arith.constant 0 : i32
    return %arg0, %c0_i32 : i32, i32
  }
  func.func @transform_1(%arg0: i32) -> (i32, i32) {
    %c0_i32 = arith.constant 0 : i32
    %c0_i32_0 = arith.constant 0 : i32
    %c0_i32_1 = arith.constant 0 : i32
    return %c0_i32, %c0_i32_0 : i32, i32
  }
  func.func @transform_2(%arg0: i32) -> (i32, i32) {
    %c0_i32 = arith.constant 0 : i32
    %c0_i32_0 = arith.constant 0 : i32
    %c0_i32_1 = arith.constant 0 : i32
    return %c0_i32, %c0_i32_0 : i32, i32
  }
  func.func @transform_3(%arg0: i32) -> (i32, i32) {
    %c0_i32 = arith.constant 0 : i32
    %c0_i32_0 = arith.constant 0 : i32
    return %arg0, %c0_i32 : i32, i32
  }
}

module attributes {stable_mosaic.version = 11 : i64} {
  func.func @linear_kernel(%arg0: i32, %arg1: memref<256x256xf32, #tpu.memory_space<vmem>>, %arg2: memref<256x128xbf16, #tpu.memory_space<vmem>>, %arg3: memref<1x128xf32, #tpu.memory_space<vmem>>, %arg4: memref<256x128xf32, #tpu.memory_space<vmem>>) attributes {dimension_semantics = [#tpu.dimension_semantics<parallel>], iteration_bounds = array<i64: 1>, scalar_prefetch = 0 : i64, scratch_operands = 0 : i64, tpu.core_type = #tpu.core_type<tc>, window_params = [{transform_indices = @transform_0, window_bounds = array<i64: 256, 256>}, {pipeline_mode = #tpu.pipeline_mode<synchronous>, transform_indices = @transform_1, window_bounds = array<i64: 256, 128>}, {pipeline_mode = #tpu.pipeline_mode<synchronous>, transform_indices = @transform_2, window_bounds = array<i64: 1, 128>}, {transform_indices = @transform_3, window_bounds = array<i64: 256, 128>}]} {
    %c0 = arith.constant 0 : index
    %c0_0 = arith.constant 0 : index
    %0 = vector.load %arg1[%c0, %c0_0] : memref<256x256xf32, #tpu.memory_space<vmem>>, vector<256x256xf32>
    %1 = arith.truncf %0 : vector<256x256xf32> to vector<256x256xbf16>
    %c0_1 = arith.constant 0 : index
    %c0_2 = arith.constant 0 : index
    %2 = vector.load %arg2[%c0_1, %c0_2] : memref<256x128xbf16, #tpu.memory_space<vmem>>, vector<256x128xbf16>
    %cst = arith.constant dense<0.000000e+00> : vector<256x128xf32>
    %3 = tpu.matmul %1, %2, %cst {dimension_numbers = #tpu.dot_dimension_numbers<[1], [0], [0], [1], [0, 0, 1, 1], [], []>} : vector<256x256xbf16>, vector<256x128xbf16>, vector<256x128xf32> -> vector<256x128xf32>
    %c0_3 = arith.constant 0 : index
    %c0_4 = arith.constant 0 : index
    %4 = vector.load %arg3[%c0_3, %c0_4] : memref<1x128xf32, #tpu.memory_space<vmem>>, vector<1x128xf32>
    %5 = vector.broadcast %4 : vector<1x128xf32> to vector<256x128xf32>
    %6 = arith.addf %3, %5 : vector<256x128xf32>
    %cst_5 = arith.constant 0.000000e+00 : f32
    %7 = vector.broadcast %cst_5 : f32 to vector<256x128xf32>
    %8 = arith.maximumf %6, %7 : vector<256x128xf32>
    %c0_6 = arith.constant 0 : index
    %c0_7 = arith.constant 0 : index
    %9 = vector.load %arg4[%c0_6, %c0_7] : memref<256x128xf32, #tpu.memory_space<vmem>>, vector<256x128xf32>
    tpu.vector_store %arg4[%c0_6, %c0_7], %8 {strides = array<i32>} : memref<256x128xf32, #tpu.memory_space<vmem>>, vector<256x128xf32>,
    return
  }
  func.func @transform_0(%arg0: i32) -> (i32, i32) {
    %c0_i32 = arith.constant 0 : i32
    %c0_i32_0 = arith.constant 0 : i32
    return %arg0, %c0_i32 : i32, i32
  }
  func.func @transform_1(%arg0: i32) -> (i32, i32) {
    %c0_i32 = arith.constant 0 : i32
    %c0_i32_0 = arith.constant 0 : i32
    %c0_i32_1 = arith.constant 0 : i32
    return %c0_i32, %c0_i32_0 : i32, i32
  }
  func.func @transform_2(%arg0: i32) -> (i32, i32) {
    %c0_i32 = arith.constant 0 : i32
    %c0_i32_0 = arith.constant 0 : i32
    %c0_i32_1 = arith.constant 0 : i32
    return %c0_i32, %c0_i32_0 : i32, i32
  }
  func.func @transform_3(%arg0: i32) -> (i32, i32) {
    %c0_i32 = arith.constant 0 : i32
    %c0_i32_0 = arith.constant 0 : i32
    return %arg0, %c0_i32 : i32, i32
  }
}

module attributes {stable_mosaic.version = 11 : i64} {
  func.func @linear_kernel(%arg0: i32, %arg1: memref<256x256xf32, #tpu.memory_space<vmem>>, %arg2: memref<256x128xbf16, #tpu.memory_space<vmem>>, %arg3: memref<1x128xf32, #tpu.memory_space<vmem>>, %arg4: memref<256x128xf32, #tpu.memory_space<vmem>>) attributes {dimension_semantics = [#tpu.dimension_semantics<parallel>], iteration_bounds = array<i64: 4>, scalar_prefetch = 0 : i64, scratch_operands = 0 : i64, tpu.core_type = #tpu.core_type<tc>, window_params = [{transform_indices = @transform_0, window_bounds = array<i64: 256, 256>}, {pipeline_mode = #tpu.pipeline_mode<synchronous>, transform_indices = @transform_1, window_bounds = array<i64: 256, 128>}, {pipeline_mode = #tpu.pipeline_mode<synchronous>, transform_indices = @transform_2, window_bounds = array<i64: 1, 128>}, {transform_indices = @transform_3, window_bounds = array<i64: 256, 128>}]} {
    %c0 = arith.constant 0 : index
    %c0_0 = arith.constant 0 : index
    %0 = vector.load %arg1[%c0, %c0_0] : memref<256x256xf32, #tpu.memory_space<vmem>>, vector<256x256xf32>
    %1 = arith.truncf %0 : vector<256x256xf32> to vector<256x256xbf16>
    %c0_1 = arith.constant 0 : index
    %c0_2 = arith.constant 0 : index
    %2 = vector.load %arg2[%c0_1, %c0_2] : memref<256x128xbf16, #tpu.memory_space<vmem>>, vector<256x128xbf16>
    %cst = arith.constant dense<0.000000e+00> : vector<256x128xf32>
    %3 = tpu.matmul %1, %2, %cst {dimension_numbers = #tpu.dot_dimension_numbers<[1], [0], [0], [1], [0, 0, 1, 1], [], []>} : vector<256x256xbf16>, vector<256x128xbf16>, vector<256x128xf32> -> vector<256x128xf32>
    %c0_3 = arith.constant 0 : index
    %c0_4 = arith.constant 0 : index
    %4 = vector.load %arg3[%c0_3, %c0_4] : memref<1x128xf32, #tpu.memory_space<vmem>>, vector<1x128xf32>
    %5 = vector.broadcast %4 : vector<1x128xf32> to vector<256x128xf32>
    %6 = arith.addf %3, %5 : vector<256x128xf32>
    %c0_5 = arith.constant 0 : index
    %c0_6 = arith.constant 0 : index
    %7 = vector.load %arg4[%c0_5, %c0_6] : memref<256x128xf32, #tpu.memory_space<vmem>>, vector<256x128xf32>
    tpu.vector_store %arg4[%c0_5, %c0_6], %6 {strides = array<i32>} : memref<256x128xf32, #tpu.memory_space<vmem>>, vector<256x128xf32>,
    return
  }
  func.func @transform_0(%arg0: i32) -> (i32, i32) {
    %c0_i32 = arith.constant 0 : i32
    %c0_i32_0 = arith.constant 0 : i32
    return %arg0, %c0_i32 : i32, i32
  }
  func.func @transform_1(%arg0: i32) -> (i32, i32) {
    %c0_i32 = arith.constant 0 : i32
    %c0_i32_0 = arith.constant 0 : i32
    %c0_i32_1 = arith.constant 0 : i32
    return %c0_i32, %c0_i32_0 : i32, i32
  }
  func.func @transform_2(%arg0: i32) -> (i32, i32) {
    %c0_i32 = arith.constant 0 : i32
    %c0_i32_0 = arith.constant 0 : i32
    %c0_i32_1 = arith.constant 0 : i32
    return %c0_i32, %c0_i32_0 : i32, i32
  }
  func.func @transform_3(%arg0: i32) -> (i32, i32) {
    %c0_i32 = arith.constant 0 : i32
    %c0_i32_0 = arith.constant 0 : i32
    return %arg0, %c0_i32 : i32, i32
  }
}

</mosaic_0001>

<bundles_post_ra>
// kernel: model_forward.5
= control target key start
LH: loop header
LB: loop body
LE: loop exit
PB: predicated region body
PF: predicated region fallthrough
CT: control target
= control target key end

     0   :  { %s672_s12 = smov 0   ;;  %s823_s0 = inlined_call_operand.vmem [shape: f32[1024,24], index: 0, kind: input, shape index: {}]   ;;  %s824_s1 = inlined_call_operand.vmem [shape: bf16[24,128], index: 1, kind: input, shape index: {}]   ;;  %s825_s2 = inlined_call_operand.vmem [shape: f32[1,128], index: 2, kind: input, shape index: {}]   ;;  %s826_s3 = inlined_call_operand.vmem [shape: f32[1024,128], index: 3, kind: output, shape index: {}]  }
   0x1 LB: > { %s544_s13 = sadd.s32 4294967295, %s650_s12   ;;  %p548_p0 = scmp.ge.s32.totalorder %s650_s12, 1  ;;  %s650_s12 = sphi %s672_s12, %s13_s12  }
   0x2   : > { %p138_p1 = scmp.lt.s32.totalorder %s650_s12, 5 }
   0x4   : > { %p139_p2 = pnand %p548_p0, %p138_p1 }
   0x5   : > { %v642_v0 = vld [vmem:[%s824_s1] sm:$0xff] (!%p139_p2)   ;;  %v643_v1 = vld [vmem:[%s824_s1 + $0x8] ss:$0 sps:$4 sm:$0xff] (!%p139_p2)   ;;  %vm291_vm0 = vcmask (!%p139_p2), 1043456   ;;  %s549_s18 = sshll.u32 (!%p139_p2), %s544_s13, 5  ;;  %vm242_vm1 = vcmask (!%p139_p2), 195584  }
   0x6   : > { %142 = sbr.rel (%p139_p2) target bundleno = 263 (0x107), region = 32  ;;  %592 = vmatprep.subr.bf16.mxu0 (!%p139_p2), %v642_v0  ;;  %628 = vmatprep.subr.bf16.mxu1 (!%p139_p2), %v642_v0  ;;  %p163_p3 = scmp.lt.s32.totalorder (!%p139_p2), %s549_s18, 127  ;;  %v293_v2 = vsel (!%p139_p2), %vm291_vm0, %v643_v1, 0  ;;  %v747_v51 = vld [vmem:[%s825_s2] ss:$0 sm:$0xff] (!%p139_p2) }
   0x7   : > { %593 = vmatpush3.bf16.msra.mxu0 (!%p139_p2), %v642_v0  ;;  %630 = vmatpush3.bf16.msra.mxu1 (!%p139_p2), %v642_v0 }
   0x8   : > { %632 = vmatprep.subr.msk.bf16.mxu0 (!%p139_p2), %vm291_vm0, %v643_v1  ;;  %633 = vmatprep.subr.msk.bf16.mxu1 (!%p139_p2), %vm291_vm0, %v643_v1 }
   0xb   : > { %595 = vmatpush3.bf16.msra.mxu0 (!%p139_p2), %v293_v2  ;;  %631 = vmatpush3.bf16.msra.mxu1 (!%p139_p2), %v293_v2 }
   0xd   : > { %s828_s18 = smov (!%p163_p3, %s549_s18), 127 }
   0xe   : > { %s550_s19 = sshll.u32 %s828_s18, 3 }
   0xf   : > { %s694_s22 = scalar_lea.vmem %s823_s0, %s550_s19  ;;  %s754_s27 = scalar_lea.vmem %s826_s3, %s550_s19 }
  0x10   : > { %v175_v3 = vld [vmem:[%s694_s22] sm:$0xff]  ;;  %v176_v4 = vld [vmem:[%s694_s22 + $0x8] sm:$0xff]  ;;  %v177_v8 = vld [vmem:[%s694_s22 + $0x10] sm:$0xff] }
  0x11   : > { %v191_v5 = vld [vmem:[%s694_s22 + $0x80] sm:$0xff]  ;;  %v207_v6 = vpack.c.bf16 %v176_v4, %v175_v3  ;;  %v192_v7 = vld [vmem:[%s694_s22 + $0x88] sm:$0xff]  ;;  %v178_v9 = vld [vmem:[%s694_s22 + $0x18] sm:$0xff] }
  0x12   : > { %v215_v10 = vpack.c.bf16 %v192_v7, %v191_v5  ;;  %v208_v11 = vpack.c.bf16 %v178_v9, %v177_v8  ;;  %v193_v12 = vld [vmem:[%s694_s22 + $0x90] sm:$0xff]  ;;  %v194_v13 = vld [vmem:[%s694_s22 + $0x98] sm:$0xff]  ;;  %v179_v14 = vld [vmem:[%s694_s22 + $0x20] sm:$0xff] }
  0x13   : > { %596 = vmatprep.mubr.msk.bf16.mxu0 %vm242_vm1, %v207_v6  ;;  %v216_v15 = vpack.c.bf16 %v194_v13, %v193_v12  ;;  %v180_v16 = vld [vmem:[%s694_s22 + $0x28] sm:$0xff]  ;;  %v195_v17 = vld [vmem:[%s694_s22 + $0xa0] sm:$0xff]  ;;  %v181_v21 = vld [vmem:[%s694_s22 + $0x30] sm:$0xff] }
  0x14   : > { %v196_v18 = vld [vmem:[%s694_s22 + $0xa8] sm:$0xff]  ;;  %612 = vmatprep.mubr.msk.bf16.mxu1 %vm242_vm1, %v215_v10  ;;  %597 = vmatmul.mubr.msk.bf16.vlgmr.msra.gmra.mrb[0].mxu0 %vm242_vm1, %v208_v11  ;;  %v209_v19 = vpack.c.bf16 %v180_v16, %v179_v14  ;;  %v182_v22 = vld [vmem:[%s694_s22 + $0x38] sm:$0xff]  ;;  %v197_v23 = vld [vmem:[%s694_s22 + $0xb0] sm:$0xff] }
  0x15   : > { %v217_v20 = vpack.c.bf16 %v196_v18, %v195_v17  ;;  %613 = vmatmul.mubr.msk.bf16.vlgmr.msra.gmra.mrb[0].mxu1 %vm242_vm1, %v216_v15  ;;  %v198_v24 = vld [vmem:[%s694_s22 + $0xb8] sm:$0xff]  ;;  %v183_v25 = vld [vmem:[%s694_s22 + $0x40] sm:$0xff]  ;;  %v184_v26 = vld [vmem:[%s694_s22 + $0x48] sm:$0xff]  ;;  %v210_v29 = vpack.c.bf16 %v182_v22, %v181_v21 }
  0x16   : > { %600 = vmatprep.mubr.msk.bf16.mxu0 %vm242_vm1, %v209_v19  ;;  %v199_v27 = vld [vmem:[%s694_s22 + $0xc0] sm:$0xff]  ;;  %v200_v28 = vld [vmem:[%s694_s22 + $0xc8] sm:$0xff]  ;;  %v218_v30 = vpack.c.bf16 %v198_v24, %v197_v23  ;;  %v211_v31 = vpack.c.bf16 %v184_v26, %v183_v25  ;;  %v185_v33 = vld [vmem:[%s694_s22 + $0x50] sm:$0xff] }
  0x17   : > { %616 = vmatprep.mubr.msk.bf16.mxu1 %vm242_vm1, %v217_v20  ;;  %v219_v32 = vpack.c.bf16 %v200_v28, %v199_v27  ;;  %v186_v34 = vld [vmem:[%s694_s22 + $0x58] sm:$0xff]  ;;  %v201_v35 = vld [vmem:[%s694_s22 + $0xd0] sm:$0xff]  ;;  %v187_v37 = vld [vmem:[%s694_s22 + $0x60] sm:$0xff] }
  0x18   : > { %v202_v36 = vld [vmem:[%s694_s22 + $0xd8] sm:$0xff]  ;;  %v188_v38 = vld [vmem:[%s694_s22 + $0x68] sm:$0xff]  ;;  %v203_v39 = vld [vmem:[%s694_s22 + $0xe0] sm:$0xff]  ;;  %v212_v41 = vpack.c.bf16 %v186_v34, %v185_v33 }
  0x19   : > { %v204_v40 = vld [vmem:[%s694_s22 + $0xe8] sm:$0xff]  ;;  %v220_v42 = vpack.c.bf16 %v202_v36, %v201_v35  ;;  %v213_v43 = vpack.c.bf16 %v188_v38, %v187_v37  ;;  %v189_v45 = vld [vmem:[%s694_s22 + $0x70] sm:$0xff]  ;;  %v190_v46 = vld [vmem:[%s694_s22 + $0x78] sm:$0xff] }
  0x1a   : > { %v221_v44 = vpack.c.bf16 %v204_v40, %v203_v39  ;;  %v205_v47 = vld [vmem:[%s694_s22 + $0xf0] sm:$0xff]  ;;  %v206_v48 = vld [vmem:[%s694_s22 + $0xf8] sm:$0xff]  ;;  %v214_v49 = vpack.c.bf16 %v190_v46, %v189_v45 }
  0x1b   : > { %v222_v50 = vpack.c.bf16 %v206_v48, %v205_v47 }
  0x1c   : > { %601 = vmatmul.mubr.msk.bf16.gmra.mrb[4].mxu0 %vm242_vm1, %v210_v29 }
  0x1d   : > { %617 = vmatmul.mubr.msk.bf16.gmra.mrb[4].mxu1 %vm242_vm1, %v218_v30  ;;  %604 = vmatprep.mubr.msk.bf16.mxu0 %vm242_vm1, %v211_v31 }
  0x1e   : > { %620 = vmatprep.mubr.msk.bf16.mxu1 %vm242_vm1, %v219_v32 }
  0x24   : > { %605 = vmatmul.mubr.msk.bf16.gmra.mrb[8].mxu0 %vm242_vm1, %v212_v41 }
  0x25   : > { %621 = vmatmul.mubr.msk.bf16.gmra.mrb[8].mxu1 %vm242_vm1, %v220_v42  ;;  %608 = vmatprep.mubr.msk.bf16.mxu0 %vm242_vm1, %v213_v43 }
  0x26   : > { %624 = vmatprep.mubr.msk.bf16.mxu1 %vm242_vm1, %v221_v44 }
  0x2c   : > { %609 = vmatmul.mubr.msk.bf16.gmra.mrb[12].mxu0 %vm242_vm1, %v214_v49 }
  0x2d   : > { %625 = vmatmul.mubr.msk.bf16.gmra.mrb[12].mxu1 %vm242_vm1, %v222_v50 }
  0xe7   : > { %v598_v52 = vpop.f32.mrb[0].mxu0 }
  0xe8   : > { %v338_v53 = vadd.f32 %v598_v52, %v747_v51  ;;  %v614_v54 = vpop.f32.mrb[0].mxu1  ;;  %v329_v55 = vpop.f32.mrb[1].mxu0 }
  0xe9   : > { %v402_v56 = vadd.f32 %v614_v54, %v747_v51  ;;  %v330_v57 = vadd.f32 %v747_v51, %v329_v55  ;;  %v393_v58 = vpop.f32.mrb[1].mxu1  ;;  %v599_v59 = vpop.f32.mrb[2].mxu0 }
  0xea   : > { %458 = vst [vmem:[%s754_s27 + $0x10] sm:$0xff] %v338_v53  ;;  %v394_v60 = vadd.f32 %v747_v51, %v393_v58  ;;  %v341_v61 = vadd.f32 %v599_v59, %v747_v51  ;;  %v615_v62 = vpop.f32.mrb[2].mxu1  ;;  %v332_v63 = vpop.f32.mrb[3].mxu0 }
  0xeb   : > { %474 = vst [vmem:[%s754_s27 + $0x90] sm:$0xff] %v402_v56  ;;  %456 = vst [vmem:[%s754_s27] sm:$0xff] %v330_v57  ;;  %v405_v0 = vadd.f32 %v615_v62, %v747_v51  ;;  %v333_v1 = vadd.f32 %v747_v51, %v332_v63  ;;  %v396_v2 = vpop.f32.mrb[3].mxu1 }
  0xec   : > { %472 = vst [vmem:[%s754_s27 + $0x80] sm:$0xff] %v394_v60  ;;  %459 = vst [vmem:[%s754_s27 + $0x18] sm:$0xff] %v341_v61  ;;  %v397_v3 = vadd.f32 %v747_v51, %v396_v2 }
  0xed   : > { %475 = vst [vmem:[%s754_s27 + $0x98] sm:$0xff] %v405_v0  ;;  %457 = vst [vmem:[%s754_s27 + $0x8] sm:$0xff] %v333_v1 }
  0xee   : > { %473 = vst [vmem:[%s754_s27 + $0x88] sm:$0xff] %v397_v3 }
  0xef   : > { %v602_v4 = vpop.f32.mrb[4].mxu0 }
  0xf0   : > { %v354_v5 = vadd.f32 %v602_v4, %v747_v51  ;;  %v618_v6 = vpop.f32.mrb[4].mxu1  ;;  %v345_v7 = vpop.f32.mrb[5].mxu0 }
  0xf1   : > { %v418_v8 = vadd.f32 %v618_v6, %v747_v51  ;;  %v346_v9 = vadd.f32 %v747_v51, %v345_v7  ;;  %v409_v10 = vpop.f32.mrb[5].mxu1  ;;  %v603_v11 = vpop.f32.mrb[6].mxu0 }
  0xf2   : > { %462 = vst [vmem:[%s754_s27 + $0x30] sm:$0xff] %v354_v5  ;;  %v410_v12 = vadd.f32 %v747_v51, %v409_v10  ;;  %v357_v13 = vadd.f32 %v603_v11, %v747_v51  ;;  %v619_v14 = vpop.f32.mrb[6].mxu1  ;;  %v348_v15 = vpop.f32.mrb[7].mxu0 }
  0xf3   : > { %478 = vst [vmem:[%s754_s27 + $0xb0] sm:$0xff] %v418_v8  ;;  %460 = vst [vmem:[%s754_s27 + $0x20] sm:$0xff] %v346_v9  ;;  %v421_v16 = vadd.f32 %v619_v14, %v747_v51  ;;  %v349_v17 = vadd.f32 %v747_v51, %v348_v15  ;;  %v412_v18 = vpop.f32.mrb[7].mxu1 }
  0xf4   : > { %476 = vst [vmem:[%s754_s27 + $0xa0] sm:$0xff] %v410_v12  ;;  %463 = vst [vmem:[%s754_s27 + $0x38] sm:$0xff] %v357_v13  ;;  %v413_v19 = vadd.f32 %v747_v51, %v412_v18 }
  0xf5   : > { %479 = vst [vmem:[%s754_s27 + $0xb8] sm:$0xff] %v421_v16  ;;  %461 = vst [vmem:[%s754_s27 + $0x28] sm:$0xff] %v349_v17 }
  0xf6   : > { %477 = vst [vmem:[%s754_s27 + $0xa8] sm:$0xff] %v413_v19 }
  0xf7   : > { %v606_v20 = vpop.f32.mrb[8].mxu0 }
  0xf8   : > { %v370_v21 = vadd.f32 %v606_v20, %v747_v51  ;;  %v622_v22 = vpop.f32.mrb[8].mxu1  ;;  %v361_v23 = vpop.f32.mrb[9].mxu0 }
  0xf9   : > { %v434_v24 = vadd.f32 %v622_v22, %v747_v51  ;;  %v362_v25 = vadd.f32 %v747_v51, %v361_v23  ;;  %v425_v26 = vpop.f32.mrb[9].mxu1  ;;  %v607_v27 = vpop.f32.mrb[10].mxu0 }
  0xfa   : > { %466 = vst [vmem:[%s754_s27 + $0x50] sm:$0xff] %v370_v21  ;;  %v426_v28 = vadd.f32 %v747_v51, %v425_v26  ;;  %v373_v29 = vadd.f32 %v607_v27, %v747_v51  ;;  %v623_v30 = vpop.f32.mrb[10].mxu1  ;;  %v364_v31 = vpop.f32.mrb[11].mxu0 }
  0xfb   : > { %482 = vst [vmem:[%s754_s27 + $0xd0] sm:$0xff] %v434_v24  ;;  %464 = vst [vmem:[%s754_s27 + $0x40] sm:$0xff] %v362_v25  ;;  %v437_v32 = vadd.f32 %v623_v30, %v747_v51  ;;  %v365_v33 = vadd.f32 %v747_v51, %v364_v31  ;;  %v428_v34 = vpop.f32.mrb[11].mxu1 }
  0xfc   : > { %480 = vst [vmem:[%s754_s27 + $0xc0] sm:$0xff] %v426_v28  ;;  %467 = vst [vmem:[%s754_s27 + $0x58] sm:$0xff] %v373_v29  ;;  %v429_v35 = vadd.f32 %v747_v51, %v428_v34 }
  0xfd   : > { %483 = vst [vmem:[%s754_s27 + $0xd8] sm:$0xff] %v437_v32  ;;  %465 = vst [vmem:[%s754_s27 + $0x48] sm:$0xff] %v365_v33 }
  0xfe   : > { %481 = vst [vmem:[%s754_s27 + $0xc8] sm:$0xff] %v429_v35 }
  0xff   : > { %v610_v36 = vpop.f32.mrb[12].mxu0 }
 0x100   : > { %v386_v37 = vadd.f32 %v610_v36, %v747_v51  ;;  %v626_v38 = vpop.f32.mrb[12].mxu1  ;;  %v377_v39 = vpop.f32.mrb[13].mxu0 }
 0x101   : > { %v450_v40 = vadd.f32 %v626_v38, %v747_v51  ;;  %v378_v41 = vadd.f32 %v747_v51, %v377_v39  ;;  %v441_v42 = vpop.f32.mrb[13].mxu1  ;;  %v611_v43 = vpop.f32.mrb[14].mxu0 }
 0x102   : > { %470 = vst [vmem:[%s754_s27 + $0x70] sm:$0xff] %v386_v37  ;;  %v442_v44 = vadd.f32 %v747_v51, %v441_v42  ;;  %v389_v45 = vadd.f32 %v611_v43, %v747_v51  ;;  %v627_v46 = vpop.f32.mrb[14].mxu1  ;;  %v380_v47 = vpop.f32.mrb[15].mxu0 }
 0x103   : > { %486 = vst [vmem:[%s754_s27 + $0xf0] sm:$0xff] %v450_v40  ;;  %468 = vst [vmem:[%s754_s27 + $0x60] sm:$0xff] %v378_v41  ;;  %v453_v48 = vadd.f32 %v627_v46, %v747_v51  ;;  %v381_v49 = vadd.f32 %v747_v51, %v380_v47  ;;  %v444_v50 = vpop.f32.mrb[15].mxu1 }
 0x104   : > { %484 = vst [vmem:[%s754_s27 + $0xe0] sm:$0xff] %v442_v44  ;;  %471 = vst [vmem:[%s754_s27 + $0x78] sm:$0xff] %v389_v45  ;;  %v445_v52 = vadd.f32 %v747_v51, %v444_v50 }
 0x105   : > { %487 = vst [vmem:[%s754_s27 + $0xf8] sm:$0xff] %v453_v48  ;;  %469 = vst [vmem:[%s754_s27 + $0x68] sm:$0xff] %v381_v49 }
 0x106   : > { %485 = vst [vmem:[%s754_s27 + $0xe8] sm:$0xff] %v445_v52 }
 0x107 PF: > { %s13_s12 = sadd.s32 1, %s650_s12  }
 0x108   : > { %p10_p4 = scmp.ge.s32.totalorder %s13_s12, 6  }
 0x10a   :  { %12 = sbr.rel (!%p10_p4) target bundleno = 1 (0x1), region = 62 }

// kernel: model_forward.6
= control target key start
LH: loop header
LB: loop body
LE: loop exit
PB: predicated region body
PF: predicated region fallthrough
CT: control target
= control target key end

     0   :  { %v522_v0 = vmov 0   ;;  %vm190_vm0 = vcmask 130048   ;;  %s911_s1 = inlined_call_operand.vmem [shape: bf16[144,128], index: 1, kind: input, shape index: {}]   ;;  %s912_s0 = inlined_call_operand.vmem [shape: f32[256,144], index: 0, kind: input, shape index: {}]   ;;  %s913_s2 = inlined_call_operand.vmem [shape: f32[1,128], index: 2, kind: input, shape index: {}]   ;;  %s914_s3 = inlined_call_operand.vmem [shape: f32[256,128], index: 3, kind: output, shape index: {}]  }
   0x1   :  { %239 = vmatprep.subr.bf16.mxu0 %v522_v0  ;;  %494 = vmatprep.subr.bf16.mxu1 %v522_v0  ;;  %v513_v1 = vld [vmem:[%s911_s1] sm:$0xff]   ;;  %v514_v2 = vld [vmem:[%s911_s1 + $0x8] sm:$0xff]   ;;  %v515_v3 = vld [vmem:[%s911_s1 + $0x10] sm:$0xff]  }
   0x2   :  { %240 = vmatpush1.bf16.msra.mxu0 %v513_v1  ;;  %503 = vmatpush1.bf16.msra.mxu1 %v513_v1  ;;  %v16_v4 = vld [vmem:[%s912_s0 + $0x8] sm:$0xff]  ;;  %v18_v5 = vld [vmem:[%s912_s0 + $0x18] sm:$0xff]  ;;  %v517_v11 = vld [vmem:[%s911_s1 + $0x20] sm:$0xff]  }
   0x3   :  { %241 = vmatprep.subr.bf16.mxu0 %v522_v0  ;;  %495 = vmatprep.subr.bf16.mxu1 %v522_v0  ;;  %v48_v6 = vld [vmem:[%s912_s0 + $0x108] sm:$0xff]  ;;  %v516_v7 = vld [vmem:[%s911_s1 + $0x18] sm:$0xff]   ;;  %v80_v8 = vpack.c.bf16 %v18_v5, %v16_v4  ;;  %v519_v13 = vld [vmem:[%s911_s1 + $0x30] sm:$0xff]  }
   0x4   :  { %v50_v9 = vld [vmem:[%s912_s0 + $0x118] sm:$0xff]  ;;  %v518_v12 = vld [vmem:[%s911_s1 + $0x28] sm:$0xff]   ;;  %v521_v15 = vld [vmem:[%s911_s1 + $0x40] sm:$0xff]  }
   0x5   :  { %v96_v10 = vpack.c.bf16 %v50_v9, %v48_v6  ;;  %478 = vmatprep.mubr.msk.bf16.mxu0 %vm190_vm0, %v80_v8  ;;  %v520_v14 = vld [vmem:[%s911_s1 + $0x38] sm:$0xff]   ;;  %v15_v16 = vld [vmem:[%s912_s0] sm:$0xff]  ;;  %v17_v17 = vld [vmem:[%s912_s0 + $0x10] sm:$0xff] }
   0x6   :  { %242 = vmatpush1.bf16.msra.mxu0 %v514_v2  ;;  %504 = vmatpush1.bf16.msra.mxu1 %v514_v2  ;;  %v47_v18 = vld [vmem:[%s912_s0 + $0x100] sm:$0xff]  ;;  %v49_v19 = vld [vmem:[%s912_s0 + $0x110] sm:$0xff]  ;;  %v20_v20 = vld [vmem:[%s912_s0 + $0x28] sm:$0xff]  ;;  %v79_v24 = vpack.c.bf16 %v17_v17, %v15_v16 }
   0x7   :  { %243 = vmatprep.subr.bf16.mxu0 %v522_v0  ;;  %496 = vmatprep.subr.bf16.mxu1 %v522_v0  ;;  %v22_v21 = vld [vmem:[%s912_s0 + $0x38] sm:$0xff]  ;;  %v52_v22 = vld [vmem:[%s912_s0 + $0x128] sm:$0xff]  ;;  %v95_v25 = vpack.c.bf16 %v49_v19, %v47_v18  ;;  %v19_v28 = vld [vmem:[%s912_s0 + $0x20] sm:$0xff] }
   0x8   :  { %486 = vmatprep.mubr.msk.bf16.mxu1 %vm190_vm0, %v96_v10  ;;  %v54_v23 = vld [vmem:[%s912_s0 + $0x138] sm:$0xff]  ;;  %v82_v26 = vpack.c.bf16 %v22_v21, %v20_v20  ;;  %v21_v29 = vld [vmem:[%s912_s0 + $0x30] sm:$0xff]  ;;  %v51_v30 = vld [vmem:[%s912_s0 + $0x120] sm:$0xff] }
   0x9   :  { %v98_v27 = vpack.c.bf16 %v54_v23, %v52_v22  ;;  %v53_v31 = vld [vmem:[%s912_s0 + $0x130] sm:$0xff]  ;;  %v24_v32 = vld [vmem:[%s912_s0 + $0x48] sm:$0xff]  ;;  %v26_v33 = vld [vmem:[%s912_s0 + $0x58] sm:$0xff]  ;;  %v81_v36 = vpack.c.bf16 %v21_v29, %v19_v28 }
   0xa   :  { %244 = vmatpush1.bf16.msra.mxu0 %v515_v3  ;;  %505 = vmatpush1.bf16.msra.mxu1 %v515_v3  ;;  %v56_v34 = vld [vmem:[%s912_s0 + $0x148] sm:$0xff]  ;;  %v58_v35 = vld [vmem:[%s912_s0 + $0x158] sm:$0xff]  ;;  %v97_v37 = vpack.c.bf16 %v53_v31, %v51_v30  ;;  %v84_v38 = vpack.c.bf16 %v26_v33, %v24_v32  ;;  %v23_v40 = vld [vmem:[%s912_s0 + $0x40] sm:$0xff] }
   0xb   :  { %245 = vmatprep.subr.bf16.mxu0 %v522_v0  ;;  %497 = vmatprep.subr.bf16.mxu1 %v522_v0  ;;  %v100_v39 = vpack.c.bf16 %v58_v35, %v56_v34  ;;  %v25_v41 = vld [vmem:[%s912_s0 + $0x50] sm:$0xff]  ;;  %v55_v42 = vld [vmem:[%s912_s0 + $0x140] sm:$0xff]  ;;  %v28_v44 = vld [vmem:[%s912_s0 + $0x68] sm:$0xff] }
   0xc   :  { %v57_v43 = vld [vmem:[%s912_s0 + $0x150] sm:$0xff]  ;;  %v30_v45 = vld [vmem:[%s912_s0 + $0x78] sm:$0xff]  ;;  %v60_v46 = vld [vmem:[%s912_s0 + $0x168] sm:$0xff]  ;;  %v83_v48 = vpack.c.bf16 %v25_v41, %v23_v40 }
   0xd   :  { %v62_v47 = vld [vmem:[%s912_s0 + $0x178] sm:$0xff]  ;;  %v99_v49 = vpack.c.bf16 %v57_v43, %v55_v42  ;;  %v86_v50 = vpack.c.bf16 %v30_v45, %v28_v44  ;;  %v27_v52 = vld [vmem:[%s912_s0 + $0x60] sm:$0xff]  ;;  %v29_v53 = vld [vmem:[%s912_s0 + $0x70] sm:$0xff] }
   0xe   :  { %246 = vmatpush1.bf16.msra.mxu0 %v516_v7  ;;  %506 = vmatpush1.bf16.msra.mxu1 %v516_v7  ;;  %v102_v51 = vpack.c.bf16 %v62_v47, %v60_v46  ;;  %v59_v54 = vld [vmem:[%s912_s0 + $0x160] sm:$0xff]  ;;  %v61_v55 = vld [vmem:[%s912_s0 + $0x170] sm:$0xff]  ;;  %v32_v56 = vld [vmem:[%s912_s0 + $0x88] sm:$0xff]  ;;  %v85_v60 = vpack.c.bf16 %v29_v53, %v27_v52 }
   0xf   :  { %247 = vmatprep.subr.bf16.mxu0 %v522_v0  ;;  %498 = vmatprep.subr.bf16.mxu1 %v522_v0  ;;  %v34_v57 = vld [vmem:[%s912_s0 + $0x98] sm:$0xff]  ;;  %v64_v58 = vld [vmem:[%s912_s0 + $0x188] sm:$0xff]  ;;  %v101_v61 = vpack.c.bf16 %v61_v55, %v59_v54  ;;  %v33_v1 = vld [vmem:[%s912_s0 + $0x90] sm:$0xff] }
  0x10   :  { %v66_v59 = vld [vmem:[%s912_s0 + $0x198] sm:$0xff]  ;;  %v88_v62 = vpack.c.bf16 %v34_v57, %v32_v56  ;;  %v63_v2 = vld [vmem:[%s912_s0 + $0x180] sm:$0xff]  ;;  %v65_v3 = vld [vmem:[%s912_s0 + $0x190] sm:$0xff] }
  0x11   :  { %v104_v63 = vpack.c.bf16 %v66_v59, %v64_v58  ;;  %v36_v4 = vld [vmem:[%s912_s0 + $0xa8] sm:$0xff]  ;;  %v38_v5 = vld [vmem:[%s912_s0 + $0xb8] sm:$0xff]  ;;  %v103_v9 = vpack.c.bf16 %v65_v3, %v63_v2  ;;  %v781_v42 = vld [vmem:[%s913_s2] ss:$0 sm:$0xff] }
  0x12   :  { %248 = vmatpush1.bf16.msra.mxu0 %v517_v11  ;;  %507 = vmatpush1.bf16.msra.mxu1 %v517_v11  ;;  %v68_v6 = vld [vmem:[%s912_s0 + $0x1a8] sm:$0xff]  ;;  %v70_v7 = vld [vmem:[%s912_s0 + $0x1b8] sm:$0xff]  ;;  %v90_v10 = vpack.c.bf16 %v38_v5, %v36_v4 }
  0x13   :  { %249 = vmatprep.subr.bf16.mxu0 %v522_v0  ;;  %499 = vmatprep.subr.bf16.mxu1 %v522_v0  ;;  %v106_v11 = vpack.c.bf16 %v70_v7, %v68_v6  ;;  %v40_v16 = vld [vmem:[%s912_s0 + $0xc8] sm:$0xff]  ;;  %v42_v17 = vld [vmem:[%s912_s0 + $0xd8] sm:$0xff] }
  0x14   :  { %v72_v18 = vld [vmem:[%s912_s0 + $0x1c8] sm:$0xff]  ;;  %v74_v19 = vld [vmem:[%s912_s0 + $0x1d8] sm:$0xff]  ;;  %v92_v22 = vpack.c.bf16 %v42_v17, %v40_v16 }
  0x15   :  { %v108_v23 = vpack.c.bf16 %v74_v19, %v72_v18  ;;  %v44_v28 = vld [vmem:[%s912_s0 + $0xe8] sm:$0xff]  ;;  %v46_v29 = vld [vmem:[%s912_s0 + $0xf8] sm:$0xff] }
  0x16   :  { %250 = vmatpush1.bf16.msra.mxu0 %v518_v12  ;;  %508 = vmatpush1.bf16.msra.mxu1 %v518_v12  ;;  %v35_v12 = vld [vmem:[%s912_s0 + $0xa0] sm:$0xff]  ;;  %v76_v30 = vld [vmem:[%s912_s0 + $0x1e8] sm:$0xff]  ;;  %v78_v31 = vld [vmem:[%s912_s0 + $0x1f8] sm:$0xff]  ;;  %v94_v34 = vpack.c.bf16 %v46_v29, %v44_v28 }
  0x17   :  { %251 = vmatprep.subr.bf16.mxu0 %v522_v0  ;;  %500 = vmatprep.subr.bf16.mxu1 %v522_v0  ;;  %v110_v35 = vpack.c.bf16 %v78_v31, %v76_v30 }
  0x1a   :  { %252 = vmatpush1.bf16.msra.mxu0 %v519_v13  ;;  %509 = vmatpush1.bf16.msra.mxu1 %v519_v13  ;;  %v37_v13 = vld [vmem:[%s912_s0 + $0xb0] sm:$0xff] }
  0x1b   :  { %253 = vmatprep.subr.bf16.mxu0 %v522_v0  ;;  %501 = vmatprep.subr.bf16.mxu1 %v522_v0  ;;  %v89_v20 = vpack.c.bf16 %v37_v13, %v35_v12 }
  0x1e   :  { %254 = vmatpush1.bf16.msra.mxu0 %v520_v14  ;;  %510 = vmatpush1.bf16.msra.mxu1 %v520_v14  ;;  %v67_v14 = vld [vmem:[%s912_s0 + $0x1a0] sm:$0xff] }
  0x1f   :  { %255 = vmatprep.subr.bf16.mxu0 %v522_v0  ;;  %502 = vmatprep.subr.bf16.mxu1 %v522_v0  ;;  %v31_v0 = vld [vmem:[%s912_s0 + $0x80] sm:$0xff] }
  0x20   :  { %v87_v8 = vpack.c.bf16 %v33_v1, %v31_v0 }
  0x22   :  { %256 = vmatpush1.bf16.msra.mxu0 %v521_v15  ;;  %511 = vmatpush1.bf16.msra.mxu1 %v521_v15  ;;  %v69_v15 = vld [vmem:[%s912_s0 + $0x1b0] sm:$0xff] }
  0x23   :  { %v105_v21 = vpack.c.bf16 %v69_v15, %v67_v14 }
  0x25   :  { %272 = vmatmul.mubr.bf16.vlgmr.msra.gmra.mrb[0].mxu0 %v79_v24  ;;  %336 = vmatmul.mubr.bf16.vlgmr.msra.gmra.mrb[0].mxu1 %v95_v25  ;;  %v39_v24 = vld [vmem:[%s912_s0 + $0xc0] sm:$0xff]  ;;  %v41_v25 = vld [vmem:[%s912_s0 + $0xd0] sm:$0xff] }
  0x26   :  { %479 = vmatprep.mubr.msk.bf16.mxu0 %vm190_vm0, %v82_v26  ;;  %487 = vmatprep.mubr.msk.bf16.mxu1 %vm190_vm0, %v98_v27  ;;  %v71_v26 = vld [vmem:[%s912_s0 + $0x1c0] sm:$0xff]  ;;  %v73_v27 = vld [vmem:[%s912_s0 + $0x1d0] sm:$0xff]  ;;  %v91_v32 = vpack.c.bf16 %v41_v25, %v39_v24 }
  0x27   :  { %v107_v33 = vpack.c.bf16 %v73_v27, %v71_v26 }
  0x2d   :  { %280 = vmatmul.mubr.bf16.gmra.mrb[4].mxu0 %v81_v36  ;;  %344 = vmatmul.mubr.bf16.gmra.mrb[4].mxu1 %v97_v37  ;;  %v43_v36 = vld [vmem:[%s912_s0 + $0xe0] sm:$0xff]  ;;  %v45_v37 = vld [vmem:[%s912_s0 + $0xf0] sm:$0xff] }
  0x2e   :  { %480 = vmatprep.mubr.msk.bf16.mxu0 %vm190_vm0, %v84_v38  ;;  %488 = vmatprep.mubr.msk.bf16.mxu1 %vm190_vm0, %v100_v39  ;;  %v75_v38 = vld [vmem:[%s912_s0 + $0x1e0] sm:$0xff]  ;;  %v77_v39 = vld [vmem:[%s912_s0 + $0x1f0] sm:$0xff]  ;;  %v93_v40 = vpack.c.bf16 %v45_v37, %v43_v36 }
  0x2f   :  { %v109_v41 = vpack.c.bf16 %v77_v39, %v75_v38 }
  0x35   :  { %288 = vmatmul.mubr.bf16.gmra.mrb[8].mxu0 %v83_v48  ;;  %352 = vmatmul.mubr.bf16.gmra.mrb[8].mxu1 %v99_v49 }
  0x36   :  { %481 = vmatprep.mubr.msk.bf16.mxu0 %vm190_vm0, %v86_v50  ;;  %489 = vmatprep.mubr.msk.bf16.mxu1 %vm190_vm0, %v102_v51 }
  0x3d   :  { %296 = vmatmul.mubr.bf16.gmra.mrb[12].mxu0 %v85_v60  ;;  %360 = vmatmul.mubr.bf16.gmra.mrb[12].mxu1 %v101_v61 }
  0x3e   :  { %482 = vmatprep.mubr.msk.bf16.mxu0 %vm190_vm0, %v88_v62  ;;  %490 = vmatprep.mubr.msk.bf16.mxu1 %vm190_vm0, %v104_v63 }
  0x45   :  { %304 = vmatmul.mubr.bf16.gmra.mrb[16].mxu0 %v87_v8  ;;  %368 = vmatmul.mubr.bf16.gmra.mrb[16].mxu1 %v103_v9 }
  0x46   :  { %483 = vmatprep.mubr.msk.bf16.mxu0 %vm190_vm0, %v90_v10  ;;  %491 = vmatprep.mubr.msk.bf16.mxu1 %vm190_vm0, %v106_v11 }
  0x4d   :  { %312 = vmatmul.mubr.bf16.gmra.mrb[20].mxu0 %v89_v20  ;;  %376 = vmatmul.mubr.bf16.gmra.mrb[20].mxu1 %v105_v21 }
  0x4e   :  { %484 = vmatprep.mubr.msk.bf16.mxu0 %vm190_vm0, %v92_v22  ;;  %492 = vmatprep.mubr.msk.bf16.mxu1 %vm190_vm0, %v108_v23 }
  0x55   :  { %320 = vmatmul.mubr.bf16.gmra.mrb[24].mxu0 %v91_v32  ;;  %384 = vmatmul.mubr.bf16.gmra.mrb[24].mxu1 %v107_v33 }
  0x56   :  { %485 = vmatprep.mubr.msk.bf16.mxu0 %vm190_vm0, %v94_v34  ;;  %493 = vmatprep.mubr.msk.bf16.mxu1 %vm190_vm0, %v110_v35 }
  0x5d   :  { %328 = vmatmul.mubr.bf16.gmra.mrb[28].mxu0 %v93_v40  ;;  %392 = vmatmul.mubr.bf16.gmra.mrb[28].mxu1 %v109_v41 }
  0xf8   :  { %v273_v43 = vpop.f32.mrb[0].mxu0  ;;  %v337_v44 = vpop.f32.mrb[0].mxu1 }
  0xf9   :  { %v274_v45 = vadd.f32 %v781_v42, %v273_v43  ;;  %v338_v46 = vadd.f32 %v781_v42, %v337_v44  ;;  %v275_v47 = vpop.f32.mrb[1].mxu0  ;;  %v339_v48 = vpop.f32.mrb[1].mxu1 }
  0xfa   :  { %v276_v49 = vpop.f32.mrb[2].mxu0  ;;  %v340_v50 = vpop.f32.mrb[2].mxu1 }
  0xfb   :  { %v400_v51 = vmax.f32 %v274_v45, 0.0  ;;  %v416_v52 = vmax.f32 %v338_v46, 0.0  ;;  %v277_v53 = vadd.f32 %v781_v42, %v276_v49  ;;  %v341_v54 = vadd.f32 %v781_v42, %v340_v50  ;;  %v278_v55 = vpop.f32.mrb[3].mxu0  ;;  %v342_v56 = vpop.f32.mrb[3].mxu1 }
  0xfd   :  { %432 = vst [vmem:[%s914_s3] sm:$0xff] %v400_v51  ;;  %448 = vst [vmem:[%s914_s3 + $0x80] sm:$0xff] %v416_v52  ;;  %v401_v57 = vmax.f32 %v277_v53, 0.0  ;;  %v417_v58 = vmax.f32 %v341_v54, 0.0 }
  0xff   :  { %433 = vst [vmem:[%s914_s3 + $0x8] sm:$0xff] %v401_v57  ;;  %449 = vst [vmem:[%s914_s3 + $0x88] sm:$0xff] %v417_v58 }
 0x100   :  { %v281_v59 = vpop.f32.mrb[4].mxu0  ;;  %v345_v60 = vpop.f32.mrb[4].mxu1 }
 0x101   :  { %v282_v61 = vadd.f32 %v781_v42, %v281_v59  ;;  %v346_v62 = vadd.f32 %v781_v42, %v345_v60  ;;  %v283_v63 = vpop.f32.mrb[5].mxu0  ;;  %v347_v0 = vpop.f32.mrb[5].mxu1 }
 0x102   :  { %v284_v1 = vpop.f32.mrb[6].mxu0  ;;  %v348_v2 = vpop.f32.mrb[6].mxu1 }
 0x103   :  { %v402_v3 = vmax.f32 %v282_v61, 0.0  ;;  %v418_v4 = vmax.f32 %v346_v62, 0.0  ;;  %v285_v5 = vadd.f32 %v781_v42, %v284_v1  ;;  %v349_v6 = vadd.f32 %v781_v42, %v348_v2  ;;  %v286_v7 = vpop.f32.mrb[7].mxu0  ;;  %v350_v8 = vpop.f32.mrb[7].mxu1 }
 0x105   :  { %434 = vst [vmem:[%s914_s3 + $0x10] sm:$0xff] %v402_v3  ;;  %450 = vst [vmem:[%s914_s3 + $0x90] sm:$0xff] %v418_v4  ;;  %v403_v9 = vmax.f32 %v285_v5, 0.0  ;;  %v419_v10 = vmax.f32 %v349_v6, 0.0 }
 0x107   :  { %435 = vst [vmem:[%s914_s3 + $0x18] sm:$0xff] %v403_v9  ;;  %451 = vst [vmem:[%s914_s3 + $0x98] sm:$0xff] %v419_v10 }
 0x108   :  { %v289_v11 = vpop.f32.mrb[8].mxu0  ;;  %v353_v12 = vpop.f32.mrb[8].mxu1 }
 0x109   :  { %v290_v13 = vadd.f32 %v781_v42, %v289_v11  ;;  %v354_v14 = vadd.f32 %v781_v42, %v353_v12  ;;  %v291_v15 = vpop.f32.mrb[9].mxu0  ;;  %v355_v16 = vpop.f32.mrb[9].mxu1 }
 0x10a   :  { %v292_v17 = vpop.f32.mrb[10].mxu0  ;;  %v356_v18 = vpop.f32.mrb[10].mxu1 }
 0x10b   :  { %v404_v19 = vmax.f32 %v290_v13, 0.0  ;;  %v420_v20 = vmax.f32 %v354_v14, 0.0  ;;  %v293_v21 = vadd.f32 %v781_v42, %v292_v17  ;;  %v357_v22 = vadd.f32 %v781_v42, %v356_v18  ;;  %v294_v23 = vpop.f32.mrb[11].mxu0  ;;  %v358_v24 = vpop.f32.mrb[11].mxu1 }
 0x10d   :  { %436 = vst [vmem:[%s914_s3 + $0x20] sm:$0xff] %v404_v19  ;;  %452 = vst [vmem:[%s914_s3 + $0xa0] sm:$0xff] %v420_v20  ;;  %v405_v25 = vmax.f32 %v293_v21, 0.0  ;;  %v421_v26 = vmax.f32 %v357_v22, 0.0 }
 0x10f   :  { %437 = vst [vmem:[%s914_s3 + $0x28] sm:$0xff] %v405_v25  ;;  %453 = vst [vmem:[%s914_s3 + $0xa8] sm:$0xff] %v421_v26 }
 0x110   :  { %v297_v27 = vpop.f32.mrb[12].mxu0  ;;  %v361_v28 = vpop.f32.mrb[12].mxu1 }
 0x111   :  { %v298_v29 = vadd.f32 %v781_v42, %v297_v27  ;;  %v362_v30 = vadd.f32 %v781_v42, %v361_v28  ;;  %v299_v31 = vpop.f32.mrb[13].mxu0  ;;  %v363_v32 = vpop.f32.mrb[13].mxu1 }
 0x112   :  { %v300_v33 = vpop.f32.mrb[14].mxu0  ;;  %v364_v34 = vpop.f32.mrb[14].mxu1 }
 0x113   :  { %v406_v35 = vmax.f32 %v298_v29, 0.0  ;;  %v422_v36 = vmax.f32 %v362_v30, 0.0  ;;  %v301_v37 = vadd.f32 %v781_v42, %v300_v33  ;;  %v365_v38 = vadd.f32 %v781_v42, %v364_v34  ;;  %v302_v39 = vpop.f32.mrb[15].mxu0  ;;  %v366_v40 = vpop.f32.mrb[15].mxu1 }
 0x115   :  { %438 = vst [vmem:[%s914_s3 + $0x30] sm:$0xff] %v406_v35  ;;  %454 = vst [vmem:[%s914_s3 + $0xb0] sm:$0xff] %v422_v36  ;;  %v407_v41 = vmax.f32 %v301_v37, 0.0  ;;  %v423_v43 = vmax.f32 %v365_v38, 0.0 }
 0x117   :  { %439 = vst [vmem:[%s914_s3 + $0x38] sm:$0xff] %v407_v41  ;;  %455 = vst [vmem:[%s914_s3 + $0xb8] sm:$0xff] %v423_v43 }
 0x118   :  { %v305_v44 = vpop.f32.mrb[16].mxu0  ;;  %v369_v45 = vpop.f32.mrb[16].mxu1 }
 0x119   :  { %v306_v46 = vadd.f32 %v781_v42, %v305_v44  ;;  %v370_v47 = vadd.f32 %v781_v42, %v369_v45  ;;  %v307_v48 = vpop.f32.mrb[17].mxu0  ;;  %v371_v49 = vpop.f32.mrb[17].mxu1 }
 0x11a   :  { %v308_v50 = vpop.f32.mrb[18].mxu0  ;;  %v372_v51 = vpop.f32.mrb[18].mxu1 }
 0x11b   :  { %v408_v52 = vmax.f32 %v306_v46, 0.0  ;;  %v424_v53 = vmax.f32 %v370_v47, 0.0  ;;  %v309_v54 = vadd.f32 %v781_v42, %v308_v50  ;;  %v373_v55 = vadd.f32 %v781_v42, %v372_v51  ;;  %v310_v56 = vpop.f32.mrb[19].mxu0  ;;  %v374_v57 = vpop.f32.mrb[19].mxu1 }
 0x11d   :  { %440 = vst [vmem:[%s914_s3 + $0x40] sm:$0xff] %v408_v52  ;;  %456 = vst [vmem:[%s914_s3 + $0xc0] sm:$0xff] %v424_v53  ;;  %v409_v58 = vmax.f32 %v309_v54, 0.0  ;;  %v425_v59 = vmax.f32 %v373_v55, 0.0 }
 0x11f   :  { %441 = vst [vmem:[%s914_s3 + $0x48] sm:$0xff] %v409_v58  ;;  %457 = vst [vmem:[%s914_s3 + $0xc8] sm:$0xff] %v425_v59 }
 0x120   :  { %v313_v60 = vpop.f32.mrb[20].mxu0  ;;  %v377_v61 = vpop.f32.mrb[20].mxu1 }
 0x121   :  { %v314_v62 = vadd.f32 %v781_v42, %v313_v60  ;;  %v378_v63 = vadd.f32 %v781_v42, %v377_v61  ;;  %v315_v0 = vpop.f32.mrb[21].mxu0  ;;  %v379_v1 = vpop.f32.mrb[21].mxu1 }
 0x122   :  { %v316_v2 = vpop.f32.mrb[22].mxu0  ;;  %v380_v3 = vpop.f32.mrb[22].mxu1 }
 0x123   :  { %v410_v4 = vmax.f32 %v314_v62, 0.0  ;;  %v426_v5 = vmax.f32 %v378_v63, 0.0  ;;  %v317_v6 = vadd.f32 %v781_v42, %v316_v2  ;;  %v381_v7 = vadd.f32 %v781_v42, %v380_v3  ;;  %v318_v8 = vpop.f32.mrb[23].mxu0  ;;  %v382_v9 = vpop.f32.mrb[23].mxu1 }
 0x125   :  { %442 = vst [vmem:[%s914_s3 + $0x50] sm:$0xff] %v410_v4  ;;  %458 = vst [vmem:[%s914_s3 + $0xd0] sm:$0xff] %v426_v5  ;;  %v411_v10 = vmax.f32 %v317_v6, 0.0  ;;  %v427_v11 = vmax.f32 %v381_v7, 0.0 }
 0x127   :  { %443 = vst [vmem:[%s914_s3 + $0x58] sm:$0xff] %v411_v10  ;;  %459 = vst [vmem:[%s914_s3 + $0xd8] sm:$0xff] %v427_v11 }
 0x128   :  { %v321_v12 = vpop.f32.mrb[24].mxu0  ;;  %v385_v13 = vpop.f32.mrb[24].mxu1 }
 0x129   :  { %v322_v14 = vadd.f32 %v781_v42, %v321_v12  ;;  %v386_v15 = vadd.f32 %v781_v42, %v385_v13  ;;  %v323_v16 = vpop.f32.mrb[25].mxu0  ;;  %v387_v17 = vpop.f32.mrb[25].mxu1 }
 0x12a   :  { %v324_v18 = vpop.f32.mrb[26].mxu0  ;;  %v388_v19 = vpop.f32.mrb[26].mxu1 }
 0x12b   :  { %v412_v20 = vmax.f32 %v322_v14, 0.0  ;;  %v428_v21 = vmax.f32 %v386_v15, 0.0  ;;  %v325_v22 = vadd.f32 %v781_v42, %v324_v18  ;;  %v389_v23 = vadd.f32 %v781_v42, %v388_v19  ;;  %v326_v24 = vpop.f32.mrb[27].mxu0  ;;  %v390_v25 = vpop.f32.mrb[27].mxu1 }
 0x12d   :  { %444 = vst [vmem:[%s914_s3 + $0x60] sm:$0xff] %v412_v20  ;;  %460 = vst [vmem:[%s914_s3 + $0xe0] sm:$0xff] %v428_v21  ;;  %v413_v26 = vmax.f32 %v325_v22, 0.0  ;;  %v429_v27 = vmax.f32 %v389_v23, 0.0 }
 0x12f   :  { %445 = vst [vmem:[%s914_s3 + $0x68] sm:$0xff] %v413_v26  ;;  %461 = vst [vmem:[%s914_s3 + $0xe8] sm:$0xff] %v429_v27 }
 0x130   :  { %v329_v28 = vpop.f32.mrb[28].mxu0  ;;  %v393_v29 = vpop.f32.mrb[28].mxu1 }
 0x131   :  { %v330_v30 = vadd.f32 %v781_v42, %v329_v28  ;;  %v394_v31 = vadd.f32 %v781_v42, %v393_v29  ;;  %v331_v32 = vpop.f32.mrb[29].mxu0  ;;  %v395_v33 = vpop.f32.mrb[29].mxu1 }
 0x132   :  { %v332_v34 = vpop.f32.mrb[30].mxu0  ;;  %v396_v35 = vpop.f32.mrb[30].mxu1 }
 0x133   :  { %v414_v36 = vmax.f32 %v330_v30, 0.0  ;;  %v430_v37 = vmax.f32 %v394_v31, 0.0  ;;  %v333_v38 = vadd.f32 %v781_v42, %v332_v34  ;;  %v397_v39 = vadd.f32 %v781_v42, %v396_v35  ;;  %v334_v40 = vpop.f32.mrb[31].mxu0  ;;  %v398_v41 = vpop.f32.mrb[31].mxu1 }
 0x135   :  { %446 = vst [vmem:[%s914_s3 + $0x70] sm:$0xff] %v414_v36  ;;  %462 = vst [vmem:[%s914_s3 + $0xf0] sm:$0xff] %v430_v37  ;;  %v415_v43 = vmax.f32 %v333_v38, 0.0  ;;  %v431_v44 = vmax.f32 %v397_v39, 0.0 }
 0x137   :  { %447 = vst [vmem:[%s914_s3 + $0x78] sm:$0xff] %v415_v43  ;;  %463 = vst [vmem:[%s914_s3 + $0xf8] sm:$0xff] %v431_v44 }

// kernel: model_forward.7
= control target key start
LH: loop header
LB: loop body
LE: loop exit
PB: predicated region body
PF: predicated region fallthrough
CT: control target
= control target key end

     0   :  { %s755_s12 = smov 0   ;;  %s956_s0 = inlined_call_operand.vmem [shape: f32[1024,136], index: 0, kind: input, shape index: {}]   ;;  %s957_s1 = inlined_call_operand.vmem [shape: bf16[136,128], index: 1, kind: input, shape index: {}]   ;;  %s958_s2 = inlined_call_operand.vmem [shape: f32[1,128], index: 2, kind: input, shape index: {}]   ;;  %s959_s3 = inlined_call_operand.vmem [shape: f32[1024,128], index: 3, kind: output, shape index: {}]  }
   0x1 LB: > { %s651_s13 = sadd.s32 4294967295, %s732_s12   ;;  %p655_p0 = scmp.ge.s32.totalorder %s732_s12, 1  ;;  %s732_s12 = sphi %s755_s12, %s13_s12  }
   0x2   : > { %p139_p1 = scmp.lt.s32.totalorder %s732_s12, 5 }
   0x4   : > { %p140_p2 = pnand %p655_p0, %p139_p1 }
   0x5   : > { %v717_v0 = vld [vmem:[%s957_s1] sm:$0xff] (!%p140_p2)   ;;  %v734_v1 = vmov (!%p140_p2), 0   ;;  %v718_v2 = vld [vmem:[%s957_s1 + $0x8] sm:$0xff] (!%p140_p2)   ;;  %s656_s18 = sshll.u32 (!%p140_p2), %s651_s13, 5  ;;  %v719_v3 = vld [vmem:[%s957_s1 + $0x10] sm:$0xff] (!%p140_p2)   ;;  %vm349_vm0 = vcmask (!%p140_p2), 64512  }
   0x6   : > { %143 = sbr.rel (%p140_p2) target bundleno = 316 (0x13c), region = 32  ;;  %402 = vmatprep.subr.bf16.mxu0 (!%p140_p2), %v734_v1  ;;  %690 = vmatprep.subr.bf16.mxu1 (!%p140_p2), %v734_v1  ;;  %p165_p3 = scmp.lt.s32.totalorder (!%p140_p2), %s656_s18, 127  ;;  %v720_v7 = vld [vmem:[%s957_s1 + $0x18] sm:$0xff] (!%p140_p2)   ;;  %v721_v11 = vld [vmem:[%s957_s1 + $0x20] sm:$0xff] (!%p140_p2)   ;;  %v722_v12 = vld [vmem:[%s957_s1 + $0x28] sm:$0xff] (!%p140_p2)   ;;  %vm398_vm1 = vcmask (!%p140_p2), 1043456  }
   0x7   : > { %403 = vmatpush1.bf16.msra.mxu0 (!%p140_p2), %v717_v0  ;;  %699 = vmatpush1.bf16.msra.mxu1 (!%p140_p2), %v717_v0  ;;  %v723_v13 = vld [vmem:[%s957_s1 + $0x30] sm:$0xff] (!%p140_p2)   ;;  %v724_v14 = vld [vmem:[%s957_s1 + $0x38] sm:$0xff] (!%p140_p2)   ;;  %v725_v15 = vld [vmem:[%s957_s1 + $0x40] ss:$0 sps:$4 sm:$0xff] (!%p140_p2)  }
   0x8   : > { %404 = vmatprep.subr.bf16.mxu0 (!%p140_p2), %v734_v1  ;;  %691 = vmatprep.subr.bf16.mxu1 (!%p140_p2), %v734_v1  ;;  %v400_v21 = vsel (!%p140_p2), %vm398_vm1, %v725_v15, 0 }
   0xb   : > { %405 = vmatpush1.bf16.msra.mxu0 (!%p140_p2), %v718_v2  ;;  %700 = vmatpush1.bf16.msra.mxu1 (!%p140_p2), %v718_v2 }
   0xc   : > { %406 = vmatprep.subr.bf16.mxu0 (!%p140_p2), %v734_v1  ;;  %692 = vmatprep.subr.bf16.mxu1 (!%p140_p2), %v734_v1 }
   0xd   : > { %s961_s18 = smov (!%p165_p3, %s656_s18), 127 }
   0xe   : > { %s689_s21 = sshll.u32 %s961_s18, 4  ;;  %s660_s10 = sshll.u32 %s961_s18, 3 }
   0xf   : > { %s778_s24 = scalar_lea.vmem %s956_s0, %s689_s21  ;;  %407 = vmatpush1.bf16.msra.mxu0 %v719_v3  ;;  %701 = vmatpush1.bf16.msra.mxu1 %v719_v3  ;;  %s887_s16 = scalar_lea.vmem %s959_s3, %s660_s10 }
  0x10   : > { %v179_v4 = vld [vmem:[%s778_s24 + $0x8] sm:$0xff]  ;;  %v181_v5 = vld [vmem:[%s778_s24 + $0x18] sm:$0xff]  ;;  %408 = vmatprep.subr.bf16.mxu0 %v734_v1  ;;  %693 = vmatprep.subr.bf16.mxu1 %v734_v1  ;;  %v178_v16 = vld [vmem:[%s778_s24] sm:$0xff] }
  0x11   : > { %v211_v6 = vld [vmem:[%s778_s24 + $0x108] sm:$0xff]  ;;  %v243_v8 = vpack.c.bf16 %v181_v5, %v179_v4  ;;  %v213_v9 = vld [vmem:[%s778_s24 + $0x118] sm:$0xff]  ;;  %v180_v17 = vld [vmem:[%s778_s24 + $0x10] sm:$0xff] }
  0x12   : > { %v259_v10 = vpack.c.bf16 %v213_v9, %v211_v6  ;;  %v210_v18 = vld [vmem:[%s778_s24 + $0x100] sm:$0xff]  ;;  %v212_v19 = vld [vmem:[%s778_s24 + $0x110] sm:$0xff]  ;;  %v183_v20 = vld [vmem:[%s778_s24 + $0x28] sm:$0xff]  ;;  %v242_v25 = vpack.c.bf16 %v180_v17, %v178_v16 }
  0x13   : > { %671 = vmatprep.mubr.msk.bf16.mxu0 %vm349_vm0, %v243_v8  ;;  %409 = vmatpush1.bf16.msra.mxu0 %v720_v7  ;;  %v185_v22 = vld [vmem:[%s778_s24 + $0x38] sm:$0xff]  ;;  %v215_v23 = vld [vmem:[%s778_s24 + $0x128] sm:$0xff]  ;;  %v258_v26 = vpack.c.bf16 %v212_v19, %v210_v18  ;;  %v182_v29 = vld [vmem:[%s778_s24 + $0x20] sm:$0xff] }
  0x14   : > { %679 = vmatprep.mubr.msk.bf16.mxu1 %vm349_vm0, %v259_v10  ;;  %702 = vmatpush1.bf16.msra.mxu1 %v720_v7  ;;  %v217_v24 = vld [vmem:[%s778_s24 + $0x138] sm:$0xff]  ;;  %v245_v27 = vpack.c.bf16 %v185_v22, %v183_v20  ;;  %v184_v30 = vld [vmem:[%s778_s24 + $0x30] sm:$0xff]  ;;  %v214_v31 = vld [vmem:[%s778_s24 + $0x120] sm:$0xff] }
  0x15   : > { %410 = vmatprep.subr.bf16.mxu0 %v734_v1  ;;  %694 = vmatprep.subr.bf16.mxu1 %v734_v1  ;;  %v261_v28 = vpack.c.bf16 %v217_v24, %v215_v23  ;;  %v216_v32 = vld [vmem:[%s778_s24 + $0x130] sm:$0xff]  ;;  %v187_v33 = vld [vmem:[%s778_s24 + $0x48] sm:$0xff]  ;;  %v189_v34 = vld [vmem:[%s778_s24 + $0x58] sm:$0xff]  ;;  %v244_v37 = vpack.c.bf16 %v184_v30, %v182_v29 }
  0x16   : > { %v219_v35 = vld [vmem:[%s778_s24 + $0x148] sm:$0xff]  ;;  %v221_v36 = vld [vmem:[%s778_s24 + $0x158] sm:$0xff]  ;;  %v260_v38 = vpack.c.bf16 %v216_v32, %v214_v31  ;;  %v247_v39 = vpack.c.bf16 %v189_v34, %v187_v33  ;;  %v186_v41 = vld [vmem:[%s778_s24 + $0x40] sm:$0xff] }
  0x17   : > { %411 = vmatpush1.bf16.msra.mxu0 %v721_v11  ;;  %v263_v40 = vpack.c.bf16 %v221_v36, %v219_v35  ;;  %v188_v42 = vld [vmem:[%s778_s24 + $0x50] sm:$0xff]  ;;  %v218_v43 = vld [vmem:[%s778_s24 + $0x140] sm:$0xff]  ;;  %v191_v45 = vld [vmem:[%s778_s24 + $0x68] sm:$0xff] }
  0x18   : > { %703 = vmatpush1.bf16.msra.mxu1 %v721_v11  ;;  %412 = vmatprep.subr.bf16.mxu0 %v734_v1  ;;  %v220_v44 = vld [vmem:[%s778_s24 + $0x150] sm:$0xff]  ;;  %v193_v46 = vld [vmem:[%s778_s24 + $0x78] sm:$0xff]  ;;  %v223_v47 = vld [vmem:[%s778_s24 + $0x168] sm:$0xff]  ;;  %v246_v49 = vpack.c.bf16 %v188_v42, %v186_v41 }
  0x19   : > { %695 = vmatprep.subr.bf16.mxu1 %v734_v1  ;;  %v225_v48 = vld [vmem:[%s778_s24 + $0x178] sm:$0xff]  ;;  %v262_v50 = vpack.c.bf16 %v220_v44, %v218_v43  ;;  %v249_v51 = vpack.c.bf16 %v193_v46, %v191_v45  ;;  %v190_v53 = vld [vmem:[%s778_s24 + $0x60] sm:$0xff]  ;;  %v192_v54 = vld [vmem:[%s778_s24 + $0x70] sm:$0xff] }
  0x1a   : > { %v265_v52 = vpack.c.bf16 %v225_v48, %v223_v47  ;;  %v222_v55 = vld [vmem:[%s778_s24 + $0x160] sm:$0xff]  ;;  %v224_v56 = vld [vmem:[%s778_s24 + $0x170] sm:$0xff]  ;;  %v195_v57 = vld [vmem:[%s778_s24 + $0x88] sm:$0xff]  ;;  %v248_v61 = vpack.c.bf16 %v192_v54, %v190_v53 }
  0x1b   : > { %413 = vmatpush1.bf16.msra.mxu0 %v722_v12  ;;  %v197_v58 = vld [vmem:[%s778_s24 + $0x98] sm:$0xff]  ;;  %v227_v59 = vld [vmem:[%s778_s24 + $0x188] sm:$0xff]  ;;  %v264_v62 = vpack.c.bf16 %v224_v56, %v222_v55  ;;  %v196_v2 = vld [vmem:[%s778_s24 + $0x90] sm:$0xff] }
  0x1c   : > { %704 = vmatpush1.bf16.msra.mxu1 %v722_v12  ;;  %414 = vmatprep.subr.bf16.mxu0 %v734_v1  ;;  %v229_v60 = vld [vmem:[%s778_s24 + $0x198] sm:$0xff]  ;;  %v251_v63 = vpack.c.bf16 %v197_v58, %v195_v57  ;;  %v226_v3 = vld [vmem:[%s778_s24 + $0x180] sm:$0xff]  ;;  %v228_v4 = vld [vmem:[%s778_s24 + $0x190] sm:$0xff] }
  0x1d   : > { %696 = vmatprep.subr.bf16.mxu1 %v734_v1  ;;  %v267_v0 = vpack.c.bf16 %v229_v60, %v227_v59  ;;  %v199_v5 = vld [vmem:[%s778_s24 + $0xa8] sm:$0xff]  ;;  %v201_v6 = vld [vmem:[%s778_s24 + $0xb8] sm:$0xff]  ;;  %v266_v10 = vpack.c.bf16 %v228_v4, %v226_v3  ;;  %v230_v15 = vld [vmem:[%s778_s24 + $0x1a0] sm:$0xff] }
  0x1e   : > { %v231_v7 = vld [vmem:[%s778_s24 + $0x1a8] sm:$0xff]  ;;  %v233_v8 = vld [vmem:[%s778_s24 + $0x1b8] sm:$0xff]  ;;  %v253_v11 = vpack.c.bf16 %v201_v6, %v199_v5  ;;  %v232_v16 = vld [vmem:[%s778_s24 + $0x1b0] sm:$0xff] }
  0x1f   : > { %415 = vmatpush1.bf16.msra.mxu0 %v723_v13  ;;  %v269_v12 = vpack.c.bf16 %v233_v8, %v231_v7  ;;  %v203_v17 = vld [vmem:[%s778_s24 + $0xc8] sm:$0xff]  ;;  %v205_v18 = vld [vmem:[%s778_s24 + $0xd8] sm:$0xff]  ;;  %v268_v22 = vpack.c.bf16 %v232_v16, %v230_v15  ;;  %v882_v43 = vld [vmem:[%s958_s2] ss:$0 sm:$0xff] }
  0x20   : > { %705 = vmatpush1.bf16.msra.mxu1 %v723_v13  ;;  %416 = vmatprep.subr.bf16.mxu0 %v734_v1  ;;  %v198_v13 = vld [vmem:[%s778_s24 + $0xa0] sm:$0xff]  ;;  %v235_v19 = vld [vmem:[%s778_s24 + $0x1c8] sm:$0xff]  ;;  %v237_v20 = vld [vmem:[%s778_s24 + $0x1d8] sm:$0xff]  ;;  %v255_v23 = vpack.c.bf16 %v205_v18, %v203_v17 }
  0x21   : > { %697 = vmatprep.subr.bf16.mxu1 %v734_v1  ;;  %v271_v24 = vpack.c.bf16 %v237_v20, %v235_v19  ;;  %v207_v29 = vld [vmem:[%s778_s24 + $0xe8] sm:$0xff]  ;;  %v209_v30 = vld [vmem:[%s778_s24 + $0xf8] sm:$0xff] }
  0x22   : > { %v239_v31 = vld [vmem:[%s778_s24 + $0x1e8] sm:$0xff]  ;;  %v241_v32 = vld [vmem:[%s778_s24 + $0x1f8] sm:$0xff]  ;;  %v257_v35 = vpack.c.bf16 %v209_v30, %v207_v29 }
  0x23   : > { %417 = vmatpush1.bf16.msra.mxu0 %v724_v14  ;;  %v273_v36 = vpack.c.bf16 %v241_v32, %v239_v31 }
  0x24   : > { %706 = vmatpush1.bf16.msra.mxu1 %v724_v14  ;;  %418 = vmatprep.subr.bf16.mxu0 %v734_v1  ;;  %v200_v14 = vld [vmem:[%s778_s24 + $0xb0] sm:$0xff] }
  0x25   : > { %698 = vmatprep.subr.bf16.mxu1 %v734_v1  ;;  %v194_v1 = vld [vmem:[%s778_s24 + $0x80] sm:$0xff] }
  0x26   : > { %v250_v9 = vpack.c.bf16 %v196_v2, %v194_v1 }
  0x27   : > { %419 = vmatpush1.bf16.msra.mxu0 %v400_v21 }
  0x28   : > { %707 = vmatpush1.bf16.msra.mxu1 %v400_v21  ;;  %v252_v21 = vpack.c.bf16 %v200_v14, %v198_v13 }
  0x2a   : > { %435 = vmatmul.mubr.bf16.vlgmr.msra.gmra.mrb[0].mxu0 %v242_v25  ;;  %v202_v25 = vld [vmem:[%s778_s24 + $0xc0] sm:$0xff] }
  0x2b   : > { %499 = vmatmul.mubr.bf16.vlgmr.msra.gmra.mrb[0].mxu1 %v258_v26  ;;  %672 = vmatprep.mubr.msk.bf16.mxu0 %vm349_vm0, %v245_v27  ;;  %v204_v26 = vld [vmem:[%s778_s24 + $0xd0] sm:$0xff]  ;;  %v234_v27 = vld [vmem:[%s778_s24 + $0x1c0] sm:$0xff] }
  0x2c   : > { %680 = vmatprep.mubr.msk.bf16.mxu1 %vm349_vm0, %v261_v28  ;;  %v236_v28 = vld [vmem:[%s778_s24 + $0x1d0] sm:$0xff]  ;;  %v254_v33 = vpack.c.bf16 %v204_v26, %v202_v25 }
  0x2d   : > { %v270_v34 = vpack.c.bf16 %v236_v28, %v234_v27 }
  0x32   : > { %443 = vmatmul.mubr.bf16.gmra.mrb[4].mxu0 %v244_v37  ;;  %v206_v37 = vld [vmem:[%s778_s24 + $0xe0] sm:$0xff] }
  0x33   : > { %507 = vmatmul.mubr.bf16.gmra.mrb[4].mxu1 %v260_v38  ;;  %673 = vmatprep.mubr.msk.bf16.mxu0 %vm349_vm0, %v247_v39  ;;  %v208_v38 = vld [vmem:[%s778_s24 + $0xf0] sm:$0xff]  ;;  %v238_v39 = vld [vmem:[%s778_s24 + $0x1e0] sm:$0xff] }
  0x34   : > { %681 = vmatprep.mubr.msk.bf16.mxu1 %vm349_vm0, %v263_v40  ;;  %v240_v40 = vld [vmem:[%s778_s24 + $0x1f0] sm:$0xff]  ;;  %v256_v41 = vpack.c.bf16 %v208_v38, %v206_v37 }
  0x35   : > { %v272_v42 = vpack.c.bf16 %v240_v40, %v238_v39 }
  0x3a   : > { %451 = vmatmul.mubr.bf16.gmra.mrb[8].mxu0 %v246_v49 }
  0x3b   : > { %515 = vmatmul.mubr.bf16.gmra.mrb[8].mxu1 %v262_v50  ;;  %674 = vmatprep.mubr.msk.bf16.mxu0 %vm349_vm0, %v249_v51 }
  0x3c   : > { %682 = vmatprep.mubr.msk.bf16.mxu1 %vm349_vm0, %v265_v52 }
  0x42   : > { %459 = vmatmul.mubr.bf16.gmra.mrb[12].mxu0 %v248_v61 }
  0x43   : > { %523 = vmatmul.mubr.bf16.gmra.mrb[12].mxu1 %v264_v62  ;;  %675 = vmatprep.mubr.msk.bf16.mxu0 %vm349_vm0, %v251_v63 }
  0x44   : > { %683 = vmatprep.mubr.msk.bf16.mxu1 %vm349_vm0, %v267_v0 }
  0x4a   : > { %467 = vmatmul.mubr.bf16.gmra.mrb[16].mxu0 %v250_v9 }
  0x4b   : > { %531 = vmatmul.mubr.bf16.gmra.mrb[16].mxu1 %v266_v10  ;;  %676 = vmatprep.mubr.msk.bf16.mxu0 %vm349_vm0, %v253_v11 }
  0x4c   : > { %684 = vmatprep.mubr.msk.bf16.mxu1 %vm349_vm0, %v269_v12 }
  0x52   : > { %475 = vmatmul.mubr.bf16.gmra.mrb[20].mxu0 %v252_v21 }
  0x53   : > { %539 = vmatmul.mubr.bf16.gmra.mrb[20].mxu1 %v268_v22  ;;  %677 = vmatprep.mubr.msk.bf16.mxu0 %vm349_vm0, %v255_v23 }
  0x54   : > { %685 = vmatprep.mubr.msk.bf16.mxu1 %vm349_vm0, %v271_v24 }
  0x5a   : > { %483 = vmatmul.mubr.bf16.gmra.mrb[24].mxu0 %v254_v33 }
  0x5b   : > { %547 = vmatmul.mubr.bf16.gmra.mrb[24].mxu1 %v270_v34  ;;  %678 = vmatprep.mubr.msk.bf16.mxu0 %vm349_vm0, %v257_v35 }
  0x5c   : > { %686 = vmatprep.mubr.msk.bf16.mxu1 %vm349_vm0, %v273_v36 }
  0x62   : > { %491 = vmatmul.mubr.bf16.gmra.mrb[28].mxu0 %v256_v41 }
  0x63   : > { %555 = vmatmul.mubr.bf16.gmra.mrb[28].mxu1 %v272_v42 }
  0xfd   : > { %v436_v44 = vpop.f32.mrb[0].mxu0 }
  0xfe   : > { %v500_v45 = vpop.f32.mrb[0].mxu1  ;;  %v437_v46 = vadd.f32 %v882_v43, %v436_v44  ;;  %v438_v48 = vpop.f32.mrb[1].mxu0 }
  0xff   : > { %v501_v47 = vadd.f32 %v882_v43, %v500_v45  ;;  %v502_v49 = vpop.f32.mrb[1].mxu1  ;;  %v439_v50 = vpop.f32.mrb[2].mxu0 }
 0x100   : > { %v503_v51 = vpop.f32.mrb[2].mxu1  ;;  %563 = vst [vmem:[%s887_s16] sm:$0xff] %v437_v46  ;;  %v440_v52 = vadd.f32 %v882_v43, %v439_v50  ;;  %v441_v54 = vpop.f32.mrb[3].mxu0 }
 0x101   : > { %579 = vst [vmem:[%s887_s16 + $0x80] sm:$0xff] %v501_v47  ;;  %v504_v53 = vadd.f32 %v882_v43, %v503_v51  ;;  %v505_v55 = vpop.f32.mrb[3].mxu1 }
 0x102   : > { %564 = vst [vmem:[%s887_s16 + $0x8] sm:$0xff] %v440_v52 }
 0x103   : > { %580 = vst [vmem:[%s887_s16 + $0x88] sm:$0xff] %v504_v53 }
 0x105   : > { %v444_v56 = vpop.f32.mrb[4].mxu0 }
 0x106   : > { %v508_v57 = vpop.f32.mrb[4].mxu1  ;;  %v445_v58 = vadd.f32 %v882_v43, %v444_v56  ;;  %v446_v60 = vpop.f32.mrb[5].mxu0 }
 0x107   : > { %v509_v59 = vadd.f32 %v882_v43, %v508_v57  ;;  %v510_v61 = vpop.f32.mrb[5].mxu1  ;;  %v447_v62 = vpop.f32.mrb[6].mxu0 }
 0x108   : > { %v511_v63 = vpop.f32.mrb[6].mxu1  ;;  %565 = vst [vmem:[%s887_s16 + $0x10] sm:$0xff] %v445_v58  ;;  %v448_v0 = vadd.f32 %v882_v43, %v447_v62  ;;  %v449_v2 = vpop.f32.mrb[7].mxu0 }
 0x109   : > { %581 = vst [vmem:[%s887_s16 + $0x90] sm:$0xff] %v509_v59  ;;  %v512_v1 = vadd.f32 %v882_v43, %v511_v63  ;;  %v513_v3 = vpop.f32.mrb[7].mxu1 }
 0x10a   : > { %566 = vst [vmem:[%s887_s16 + $0x18] sm:$0xff] %v448_v0 }
 0x10b   : > { %582 = vst [vmem:[%s887_s16 + $0x98] sm:$0xff] %v512_v1 }
 0x10d   : > { %v452_v4 = vpop.f32.mrb[8].mxu0 }
 0x10e   : > { %v516_v5 = vpop.f32.mrb[8].mxu1  ;;  %v453_v6 = vadd.f32 %v882_v43, %v452_v4  ;;  %v454_v8 = vpop.f32.mrb[9].mxu0 }
 0x10f   : > { %v517_v7 = vadd.f32 %v882_v43, %v516_v5  ;;  %v518_v9 = vpop.f32.mrb[9].mxu1  ;;  %v455_v10 = vpop.f32.mrb[10].mxu0 }
 0x110   : > { %v519_v11 = vpop.f32.mrb[10].mxu1  ;;  %567 = vst [vmem:[%s887_s16 + $0x20] sm:$0xff] %v453_v6  ;;  %v456_v12 = vadd.f32 %v882_v43, %v455_v10  ;;  %v457_v14 = vpop.f32.mrb[11].mxu0 }
 0x111   : > { %583 = vst [vmem:[%s887_s16 + $0xa0] sm:$0xff] %v517_v7  ;;  %v520_v13 = vadd.f32 %v882_v43, %v519_v11  ;;  %v521_v15 = vpop.f32.mrb[11].mxu1 }
 0x112   : > { %568 = vst [vmem:[%s887_s16 + $0x28] sm:$0xff] %v456_v12 }
 0x113   : > { %584 = vst [vmem:[%s887_s16 + $0xa8] sm:$0xff] %v520_v13 }
 0x115   : > { %v460_v16 = vpop.f32.mrb[12].mxu0 }
 0x116   : > { %v524_v17 = vpop.f32.mrb[12].mxu1  ;;  %v461_v18 = vadd.f32 %v882_v43, %v460_v16  ;;  %v462_v20 = vpop.f32.mrb[13].mxu0 }
 0x117   : > { %v525_v19 = vadd.f32 %v882_v43, %v524_v17  ;;  %v526_v21 = vpop.f32.mrb[13].mxu1  ;;  %v463_v22 = vpop.f32.mrb[14].mxu0 }
 0x118   : > { %v527_v23 = vpop.f32.mrb[14].mxu1  ;;  %569 = vst [vmem:[%s887_s16 + $0x30] sm:$0xff] %v461_v18  ;;  %v464_v24 = vadd.f32 %v882_v43, %v463_v22  ;;  %v465_v26 = vpop.f32.mrb[15].mxu0 }
 0x119   : > { %585 = vst [vmem:[%s887_s16 + $0xb0] sm:$0xff] %v525_v19  ;;  %v528_v25 = vadd.f32 %v882_v43, %v527_v23  ;;  %v529_v27 = vpop.f32.mrb[15].mxu1 }
 0x11a   : > { %570 = vst [vmem:[%s887_s16 + $0x38] sm:$0xff] %v464_v24 }
 0x11b   : > { %586 = vst [vmem:[%s887_s16 + $0xb8] sm:$0xff] %v528_v25 }
 0x11d   : > { %v468_v28 = vpop.f32.mrb[16].mxu0 }
 0x11e   : > { %v532_v29 = vpop.f32.mrb[16].mxu1  ;;  %v469_v30 = vadd.f32 %v882_v43, %v468_v28  ;;  %v470_v32 = vpop.f32.mrb[17].mxu0 }
 0x11f   : > { %v533_v31 = vadd.f32 %v882_v43, %v532_v29  ;;  %v534_v33 = vpop.f32.mrb[17].mxu1  ;;  %v471_v34 = vpop.f32.mrb[18].mxu0 }
 0x120   : > { %v535_v35 = vpop.f32.mrb[18].mxu1  ;;  %571 = vst [vmem:[%s887_s16 + $0x40] sm:$0xff] %v469_v30  ;;  %v472_v36 = vadd.f32 %v882_v43, %v471_v34  ;;  %v473_v38 = vpop.f32.mrb[19].mxu0 }
 0x121   : > { %587 = vst [vmem:[%s887_s16 + $0xc0] sm:$0xff] %v533_v31  ;;  %v536_v37 = vadd.f32 %v882_v43, %v535_v35  ;;  %v537_v39 = vpop.f32.mrb[19].mxu1 }
 0x122   : > { %572 = vst [vmem:[%s887_s16 + $0x48] sm:$0xff] %v472_v36 }
 0x123   : > { %588 = vst [vmem:[%s887_s16 + $0xc8] sm:$0xff] %v536_v37 }
 0x125   : > { %v476_v40 = vpop.f32.mrb[20].mxu0 }
 0x126   : > { %v540_v41 = vpop.f32.mrb[20].mxu1  ;;  %v477_v42 = vadd.f32 %v882_v43, %v476_v40  ;;  %v478_v45 = vpop.f32.mrb[21].mxu0 }
 0x127   : > { %v541_v44 = vadd.f32 %v882_v43, %v540_v41  ;;  %v542_v46 = vpop.f32.mrb[21].mxu1  ;;  %v479_v47 = vpop.f32.mrb[22].mxu0 }
 0x128   : > { %v543_v48 = vpop.f32.mrb[22].mxu1  ;;  %573 = vst [vmem:[%s887_s16 + $0x50] sm:$0xff] %v477_v42  ;;  %v480_v49 = vadd.f32 %v882_v43, %v479_v47  ;;  %v481_v51 = vpop.f32.mrb[23].mxu0 }
 0x129   : > { %589 = vst [vmem:[%s887_s16 + $0xd0] sm:$0xff] %v541_v44  ;;  %v544_v50 = vadd.f32 %v882_v43, %v543_v48  ;;  %v545_v52 = vpop.f32.mrb[23].mxu1 }
 0x12a   : > { %574 = vst [vmem:[%s887_s16 + $0x58] sm:$0xff] %v480_v49 }
 0x12b   : > { %590 = vst [vmem:[%s887_s16 + $0xd8] sm:$0xff] %v544_v50 }
 0x12d   : > { %v484_v53 = vpop.f32.mrb[24].mxu0 }
 0x12e   : > { %v548_v54 = vpop.f32.mrb[24].mxu1  ;;  %v485_v55 = vadd.f32 %v882_v43, %v484_v53  ;;  %v486_v57 = vpop.f32.mrb[25].mxu0 }
 0x12f   : > { %v549_v56 = vadd.f32 %v882_v43, %v548_v54  ;;  %v550_v58 = vpop.f32.mrb[25].mxu1  ;;  %v487_v59 = vpop.f32.mrb[26].mxu0 }
 0x130   : > { %v551_v60 = vpop.f32.mrb[26].mxu1  ;;  %575 = vst [vmem:[%s887_s16 + $0x60] sm:$0xff] %v485_v55  ;;  %v488_v61 = vadd.f32 %v882_v43, %v487_v59  ;;  %v489_v63 = vpop.f32.mrb[27].mxu0 }
 0x131   : > { %591 = vst [vmem:[%s887_s16 + $0xe0] sm:$0xff] %v549_v56  ;;  %v552_v62 = vadd.f32 %v882_v43, %v551_v60  ;;  %v553_v0 = vpop.f32.mrb[27].mxu1 }
 0x132   : > { %576 = vst [vmem:[%s887_s16 + $0x68] sm:$0xff] %v488_v61 }
 0x133   : > { %592 = vst [vmem:[%s887_s16 + $0xe8] sm:$0xff] %v552_v62 }
 0x135   : > { %v492_v1 = vpop.f32.mrb[28].mxu0 }
 0x136   : > { %v556_v2 = vpop.f32.mrb[28].mxu1  ;;  %v493_v3 = vadd.f32 %v882_v43, %v492_v1  ;;  %v494_v5 = vpop.f32.mrb[29].mxu0 }
 0x137   : > { %v557_v4 = vadd.f32 %v882_v43, %v556_v2  ;;  %v558_v6 = vpop.f32.mrb[29].mxu1  ;;  %v495_v7 = vpop.f32.mrb[30].mxu0 }
 0x138   : > { %v559_v8 = vpop.f32.mrb[30].mxu1  ;;  %577 = vst [vmem:[%s887_s16 + $0x70] sm:$0xff] %v493_v3  ;;  %v496_v9 = vadd.f32 %v882_v43, %v495_v7  ;;  %v497_v11 = vpop.f32.mrb[31].mxu0 }
 0x139   : > { %593 = vst [vmem:[%s887_s16 + $0xf0] sm:$0xff] %v557_v4  ;;  %v560_v10 = vadd.f32 %v882_v43, %v559_v8  ;;  %v561_v12 = vpop.f32.mrb[31].mxu1 }
 0x13a   : > { %578 = vst [vmem:[%s887_s16 + $0x78] sm:$0xff] %v496_v9 }
 0x13b   : > { %594 = vst [vmem:[%s887_s16 + $0xf8] sm:$0xff] %v560_v10 }
 0x13c PF: > { %s13_s12 = sadd.s32 1, %s732_s12  }
 0x13d   : > { %p10_p4 = scmp.ge.s32.totalorder %s13_s12, 6  }
 0x13f   :  { %12 = sbr.rel (!%p10_p4) target bundleno = 1 (0x1), region = 62 }

// kernel: model_forward.8
= control target key start
LH: loop header
LB: loop body
LE: loop exit
PB: predicated region body
PF: predicated region fallthrough
CT: control target
= control target key end

     0   :  { %s1029_s1 = inlined_call_operand.vmem [shape: bf16[256,128], index: 1, kind: input, shape index: {}]   ;;  %s1030_s0 = inlined_call_operand.vmem [shape: f32[256,256], index: 0, kind: input, shape index: {}]   ;;  %s1031_s2 = inlined_call_operand.vmem [shape: f32[1,128], index: 2, kind: input, shape index: {}]   ;;  %s1032_s3 = inlined_call_operand.vmem [shape: f32[256,128], index: 3, kind: output, shape index: {}]  }
   0x1   :  { %v620_v0 = vld [vmem:[%s1029_s1 + $0x40] sm:$0xff]   ;;  %v622_v2 = vld [vmem:[%s1029_s1 + $0x48] sm:$0xff]   ;;  %v624_v4 = vld [vmem:[%s1029_s1 + $0x50] sm:$0xff]  }
   0x2   :  { %v621_v1 = vld [vmem:[%s1029_s1] sm:$0xff]   ;;  %492 = vmatprep.subr.bf16.mxu0 %v620_v0  ;;  %604 = vmatprep.subr.bf16.mxu1 %v620_v0  ;;  %v623_v3 = vld [vmem:[%s1029_s1 + $0x8] sm:$0xff]   ;;  %v625_v5 = vld [vmem:[%s1029_s1 + $0x10] sm:$0xff]  }
   0x3   :  { %493 = vmatpush3.bf16.msra.mxu0 %v621_v1  ;;  %612 = vmatpush3.bf16.msra.mxu1 %v621_v1  ;;  %v626_v6 = vld [vmem:[%s1029_s1 + $0x58] sm:$0xff]   ;;  %v628_v8 = vld [vmem:[%s1029_s1 + $0x60] sm:$0xff]   ;;  %v630_v10 = vld [vmem:[%s1029_s1 + $0x68] sm:$0xff]  }
   0x4   :  { %494 = vmatprep.subr.bf16.mxu0 %v622_v2  ;;  %605 = vmatprep.subr.bf16.mxu1 %v622_v2  ;;  %v627_v7 = vld [vmem:[%s1029_s1 + $0x18] sm:$0xff]   ;;  %v629_v9 = vld [vmem:[%s1029_s1 + $0x20] sm:$0xff]   ;;  %v16_v11 = vld [vmem:[%s1030_s0 + $0x8] sm:$0xff] }
   0x5   :  { %v18_v12 = vld [vmem:[%s1030_s0 + $0x18] sm:$0xff]  ;;  %v48_v13 = vld [vmem:[%s1030_s0 + $0x108] sm:$0xff]  ;;  %v632_v18 = vld [vmem:[%s1029_s1 + $0x70] sm:$0xff]  }
   0x6   :  { %v80_v14 = vpack.c.bf16 %v18_v12, %v16_v11  ;;  %v50_v15 = vld [vmem:[%s1030_s0 + $0x118] sm:$0xff]  ;;  %v631_v17 = vld [vmem:[%s1029_s1 + $0x28] sm:$0xff]   ;;  %v633_v19 = vld [vmem:[%s1029_s1 + $0x30] sm:$0xff]  }
   0x7   :  { %495 = vmatpush3.bf16.msra.mxu0 %v623_v3  ;;  %613 = vmatpush3.bf16.msra.mxu1 %v623_v3  ;;  %v96_v16 = vpack.c.bf16 %v50_v15, %v48_v13  ;;  %v634_v20 = vld [vmem:[%s1029_s1 + $0x78] sm:$0xff]   ;;  %v15_v22 = vld [vmem:[%s1030_s0] sm:$0xff]  ;;  %v17_v23 = vld [vmem:[%s1030_s0 + $0x10] sm:$0xff] }
   0x8   :  { %496 = vmatprep.subr.bf16.mxu0 %v624_v4  ;;  %606 = vmatprep.subr.bf16.mxu1 %v624_v4  ;;  %v635_v21 = vld [vmem:[%s1029_s1 + $0x38] sm:$0xff]   ;;  %v47_v24 = vld [vmem:[%s1030_s0 + $0x100] sm:$0xff]  ;;  %v49_v25 = vld [vmem:[%s1030_s0 + $0x110] sm:$0xff]  ;;  %v79_v30 = vpack.c.bf16 %v17_v23, %v15_v22 }
   0x9   :  { %278 = vmatprep.mubr.bf16.mxu0 %v80_v14  ;;  %342 = vmatprep.mubr.bf16.mxu1 %v96_v16  ;;  %v20_v26 = vld [vmem:[%s1030_s0 + $0x28] sm:$0xff]  ;;  %v22_v27 = vld [vmem:[%s1030_s0 + $0x38] sm:$0xff]  ;;  %v95_v31 = vpack.c.bf16 %v49_v25, %v47_v24  ;;  %v19_v34 = vld [vmem:[%s1030_s0 + $0x20] sm:$0xff] }
   0xa   :  { %v52_v28 = vld [vmem:[%s1030_s0 + $0x128] sm:$0xff]  ;;  %v54_v29 = vld [vmem:[%s1030_s0 + $0x138] sm:$0xff]  ;;  %v82_v32 = vpack.c.bf16 %v22_v27, %v20_v26  ;;  %v21_v35 = vld [vmem:[%s1030_s0 + $0x30] sm:$0xff] }
   0xb   :  { %497 = vmatpush3.bf16.msra.mxu0 %v625_v5  ;;  %614 = vmatpush3.bf16.msra.mxu1 %v625_v5  ;;  %v98_v33 = vpack.c.bf16 %v54_v29, %v52_v28  ;;  %v51_v36 = vld [vmem:[%s1030_s0 + $0x120] sm:$0xff]  ;;  %v53_v37 = vld [vmem:[%s1030_s0 + $0x130] sm:$0xff]  ;;  %v24_v38 = vld [vmem:[%s1030_s0 + $0x48] sm:$0xff]  ;;  %v81_v42 = vpack.c.bf16 %v21_v35, %v19_v34 }
   0xc   :  { %498 = vmatprep.subr.bf16.mxu0 %v626_v6  ;;  %607 = vmatprep.subr.bf16.mxu1 %v626_v6  ;;  %v26_v39 = vld [vmem:[%s1030_s0 + $0x58] sm:$0xff]  ;;  %v56_v40 = vld [vmem:[%s1030_s0 + $0x148] sm:$0xff]  ;;  %v97_v43 = vpack.c.bf16 %v53_v37, %v51_v36  ;;  %v23_v46 = vld [vmem:[%s1030_s0 + $0x40] sm:$0xff] }
   0xd   :  { %v58_v41 = vld [vmem:[%s1030_s0 + $0x158] sm:$0xff]  ;;  %v84_v44 = vpack.c.bf16 %v26_v39, %v24_v38  ;;  %v25_v47 = vld [vmem:[%s1030_s0 + $0x50] sm:$0xff]  ;;  %v55_v48 = vld [vmem:[%s1030_s0 + $0x140] sm:$0xff] }
   0xe   :  { %v100_v45 = vpack.c.bf16 %v58_v41, %v56_v40  ;;  %v57_v49 = vld [vmem:[%s1030_s0 + $0x150] sm:$0xff]  ;;  %v28_v50 = vld [vmem:[%s1030_s0 + $0x68] sm:$0xff]  ;;  %v30_v51 = vld [vmem:[%s1030_s0 + $0x78] sm:$0xff]  ;;  %v83_v54 = vpack.c.bf16 %v25_v47, %v23_v46 }
   0xf   :  { %499 = vmatpush3.bf16.msra.mxu0 %v627_v7  ;;  %615 = vmatpush3.bf16.msra.mxu1 %v627_v7  ;;  %v60_v52 = vld [vmem:[%s1030_s0 + $0x168] sm:$0xff]  ;;  %v62_v53 = vld [vmem:[%s1030_s0 + $0x178] sm:$0xff]  ;;  %v99_v55 = vpack.c.bf16 %v57_v49, %v55_v48  ;;  %v86_v56 = vpack.c.bf16 %v30_v51, %v28_v50  ;;  %v27_v58 = vld [vmem:[%s1030_s0 + $0x60] sm:$0xff] }
  0x10   :  { %500 = vmatprep.subr.bf16.mxu0 %v628_v8  ;;  %608 = vmatprep.subr.bf16.mxu1 %v628_v8  ;;  %v102_v57 = vpack.c.bf16 %v62_v53, %v60_v52  ;;  %v29_v59 = vld [vmem:[%s1030_s0 + $0x70] sm:$0xff]  ;;  %v59_v60 = vld [vmem:[%s1030_s0 + $0x160] sm:$0xff]  ;;  %v32_v62 = vld [vmem:[%s1030_s0 + $0x88] sm:$0xff] }
  0x11   :  { %v61_v61 = vld [vmem:[%s1030_s0 + $0x170] sm:$0xff]  ;;  %v34_v63 = vld [vmem:[%s1030_s0 + $0x98] sm:$0xff]  ;;  %v64_v0 = vld [vmem:[%s1030_s0 + $0x188] sm:$0xff]  ;;  %v85_v2 = vpack.c.bf16 %v29_v59, %v27_v58 }
  0x12   :  { %v66_v1 = vld [vmem:[%s1030_s0 + $0x198] sm:$0xff]  ;;  %v101_v3 = vpack.c.bf16 %v61_v61, %v59_v60  ;;  %v88_v4 = vpack.c.bf16 %v34_v63, %v32_v62  ;;  %v31_v6 = vld [vmem:[%s1030_s0 + $0x80] sm:$0xff]  ;;  %v33_v7 = vld [vmem:[%s1030_s0 + $0x90] sm:$0xff] }
  0x13   :  { %501 = vmatpush3.bf16.msra.mxu0 %v629_v9  ;;  %616 = vmatpush3.bf16.msra.mxu1 %v629_v9  ;;  %v104_v5 = vpack.c.bf16 %v66_v1, %v64_v0  ;;  %v63_v8 = vld [vmem:[%s1030_s0 + $0x180] sm:$0xff]  ;;  %v65_v9 = vld [vmem:[%s1030_s0 + $0x190] sm:$0xff]  ;;  %v38_v11 = vld [vmem:[%s1030_s0 + $0xb8] sm:$0xff]  ;;  %v87_v14 = vpack.c.bf16 %v33_v7, %v31_v6 }
  0x14   :  { %502 = vmatprep.subr.bf16.mxu0 %v630_v10  ;;  %609 = vmatprep.subr.bf16.mxu1 %v630_v10  ;;  %v36_v10 = vld [vmem:[%s1030_s0 + $0xa8] sm:$0xff]  ;;  %v70_v13 = vld [vmem:[%s1030_s0 + $0x1b8] sm:$0xff]  ;;  %v103_v15 = vpack.c.bf16 %v65_v9, %v63_v8  ;;  %v899_v50 = vld [vmem:[%s1031_s2] ss:$0 sm:$0xff] }
  0x15   :  { %v68_v12 = vld [vmem:[%s1030_s0 + $0x1a8] sm:$0xff]  ;;  %v90_v16 = vpack.c.bf16 %v38_v11, %v36_v10  ;;  %v42_v23 = vld [vmem:[%s1030_s0 + $0xd8] sm:$0xff] }
  0x16   :  { %v40_v22 = vld [vmem:[%s1030_s0 + $0xc8] sm:$0xff]  ;;  %v74_v25 = vld [vmem:[%s1030_s0 + $0x1d8] sm:$0xff] }
  0x17   :  { %503 = vmatpush3.bf16.msra.mxu0 %v631_v17  ;;  %617 = vmatpush3.bf16.msra.mxu1 %v631_v17  ;;  %v106_v17 = vpack.c.bf16 %v70_v13, %v68_v12  ;;  %v72_v24 = vld [vmem:[%s1030_s0 + $0x1c8] sm:$0xff]  ;;  %v92_v28 = vpack.c.bf16 %v42_v23, %v40_v22  ;;  %v46_v35 = vld [vmem:[%s1030_s0 + $0xf8] sm:$0xff] }
  0x18   :  { %504 = vmatprep.subr.bf16.mxu0 %v632_v18  ;;  %610 = vmatprep.subr.bf16.mxu1 %v632_v18  ;;  %v35_v18 = vld [vmem:[%s1030_s0 + $0xa0] sm:$0xff]  ;;  %v108_v29 = vpack.c.bf16 %v74_v25, %v72_v24  ;;  %v44_v34 = vld [vmem:[%s1030_s0 + $0xe8] sm:$0xff]  ;;  %v78_v37 = vld [vmem:[%s1030_s0 + $0x1f8] sm:$0xff] }
  0x19   :  { %v76_v36 = vld [vmem:[%s1030_s0 + $0x1e8] sm:$0xff]  ;;  %v94_v40 = vpack.c.bf16 %v46_v35, %v44_v34 }
  0x1a   :  { %v110_v41 = vpack.c.bf16 %v78_v37, %v76_v36 }
  0x1b   :  { %505 = vmatpush3.bf16.msra.mxu0 %v633_v19  ;;  %618 = vmatpush3.bf16.msra.mxu1 %v633_v19  ;;  %v37_v19 = vld [vmem:[%s1030_s0 + $0xb0] sm:$0xff] }
  0x1c   :  { %506 = vmatprep.subr.bf16.mxu0 %v634_v20  ;;  %611 = vmatprep.subr.bf16.mxu1 %v634_v20  ;;  %v67_v20 = vld [vmem:[%s1030_s0 + $0x1a0] sm:$0xff]  ;;  %v89_v26 = vpack.c.bf16 %v37_v19, %v35_v18 }
  0x1f   :  { %507 = vmatpush3.bf16.msra.mxu0 %v635_v21  ;;  %619 = vmatpush3.bf16.msra.mxu1 %v635_v21  ;;  %v69_v21 = vld [vmem:[%s1030_s0 + $0x1b0] sm:$0xff] }
  0x20   :  { %v105_v27 = vpack.c.bf16 %v69_v21, %v67_v20 }
  0x22   :  { %279 = vmatmul.mubr.bf16.vlgmr.msra.gmra.mrb[0].mxu0 %v79_v30  ;;  %343 = vmatmul.mubr.bf16.vlgmr.msra.gmra.mrb[0].mxu1 %v95_v31  ;;  %v39_v30 = vld [vmem:[%s1030_s0 + $0xc0] sm:$0xff]  ;;  %v41_v31 = vld [vmem:[%s1030_s0 + $0xd0] sm:$0xff] }
  0x23   :  { %286 = vmatprep.mubr.bf16.mxu0 %v82_v32  ;;  %350 = vmatprep.mubr.bf16.mxu1 %v98_v33  ;;  %v71_v32 = vld [vmem:[%s1030_s0 + $0x1c0] sm:$0xff]  ;;  %v73_v33 = vld [vmem:[%s1030_s0 + $0x1d0] sm:$0xff]  ;;  %v91_v38 = vpack.c.bf16 %v41_v31, %v39_v30 }
  0x24   :  { %v107_v39 = vpack.c.bf16 %v73_v33, %v71_v32 }
  0x2a   :  { %287 = vmatmul.mubr.bf16.gmra.mrb[4].mxu0 %v81_v42  ;;  %351 = vmatmul.mubr.bf16.gmra.mrb[4].mxu1 %v97_v43  ;;  %v43_v42 = vld [vmem:[%s1030_s0 + $0xe0] sm:$0xff]  ;;  %v45_v43 = vld [vmem:[%s1030_s0 + $0xf0] sm:$0xff] }
  0x2b   :  { %294 = vmatprep.mubr.bf16.mxu0 %v84_v44  ;;  %358 = vmatprep.mubr.bf16.mxu1 %v100_v45  ;;  %v75_v44 = vld [vmem:[%s1030_s0 + $0x1e0] sm:$0xff]  ;;  %v77_v45 = vld [vmem:[%s1030_s0 + $0x1f0] sm:$0xff]  ;;  %v93_v46 = vpack.c.bf16 %v45_v43, %v43_v42 }
  0x2c   :  { %v109_v47 = vpack.c.bf16 %v77_v45, %v75_v44 }
  0x32   :  { %295 = vmatmul.mubr.bf16.gmra.mrb[8].mxu0 %v83_v54  ;;  %359 = vmatmul.mubr.bf16.gmra.mrb[8].mxu1 %v99_v55 }
  0x33   :  { %302 = vmatprep.mubr.bf16.mxu0 %v86_v56  ;;  %366 = vmatprep.mubr.bf16.mxu1 %v102_v57 }
  0x3a   :  { %303 = vmatmul.mubr.bf16.gmra.mrb[12].mxu0 %v85_v2  ;;  %367 = vmatmul.mubr.bf16.gmra.mrb[12].mxu1 %v101_v3 }
  0x3b   :  { %310 = vmatprep.mubr.bf16.mxu0 %v88_v4  ;;  %374 = vmatprep.mubr.bf16.mxu1 %v104_v5 }
  0x42   :  { %311 = vmatmul.mubr.bf16.gmra.mrb[16].mxu0 %v87_v14  ;;  %375 = vmatmul.mubr.bf16.gmra.mrb[16].mxu1 %v103_v15 }
  0x43   :  { %318 = vmatprep.mubr.bf16.mxu0 %v90_v16  ;;  %382 = vmatprep.mubr.bf16.mxu1 %v106_v17 }
  0x4a   :  { %319 = vmatmul.mubr.bf16.gmra.mrb[20].mxu0 %v89_v26  ;;  %383 = vmatmul.mubr.bf16.gmra.mrb[20].mxu1 %v105_v27 }
  0x4b   :  { %326 = vmatprep.mubr.bf16.mxu0 %v92_v28  ;;  %390 = vmatprep.mubr.bf16.mxu1 %v108_v29 }
  0x52   :  { %327 = vmatmul.mubr.bf16.gmra.mrb[24].mxu0 %v91_v38  ;;  %391 = vmatmul.mubr.bf16.gmra.mrb[24].mxu1 %v107_v39 }
  0x53   :  { %334 = vmatprep.mubr.bf16.mxu0 %v94_v40  ;;  %398 = vmatprep.mubr.bf16.mxu1 %v110_v41 }
  0x5a   :  { %335 = vmatmul.mubr.bf16.gmra.mrb[28].mxu0 %v93_v46  ;;  %399 = vmatmul.mubr.bf16.gmra.mrb[28].mxu1 %v109_v47 }
  0xf5   :  { %v508_v48 = vpop.f32.mrb[0].mxu0  ;;  %v556_v49 = vpop.f32.mrb[0].mxu1 }
  0xf6   :  { %v509_v51 = vpop.f32.mrb[1].mxu0  ;;  %v557_v52 = vpop.f32.mrb[1].mxu1 }
  0xf7   :  { %v510_v53 = vadd.f32 %v509_v51, %v508_v48  ;;  %v558_v54 = vadd.f32 %v557_v52, %v556_v49  ;;  %v511_v55 = vpop.f32.mrb[2].mxu0  ;;  %v559_v56 = vpop.f32.mrb[2].mxu1 }
  0xf8   :  { %v512_v57 = vpop.f32.mrb[3].mxu0  ;;  %v560_v58 = vpop.f32.mrb[3].mxu1 }
  0xf9   :  { %v281_v59 = vadd.f32 %v510_v53, %v899_v50  ;;  %v345_v60 = vadd.f32 %v558_v54, %v899_v50  ;;  %v513_v61 = vadd.f32 %v512_v57, %v511_v55  ;;  %v561_v62 = vadd.f32 %v560_v58, %v559_v56 }
  0xfb   :  { %v407_v63 = vmax.f32 %v281_v59, 0.0  ;;  %v423_v0 = vmax.f32 %v345_v60, 0.0  ;;  %v284_v1 = vadd.f32 %v513_v61, %v899_v50  ;;  %v348_v2 = vadd.f32 %v561_v62, %v899_v50 }
  0xfd   :  { %439 = vst [vmem:[%s1032_s3] sm:$0xff] %v407_v63  ;;  %455 = vst [vmem:[%s1032_s3 + $0x80] sm:$0xff] %v423_v0  ;;  %v408_v3 = vmax.f32 %v284_v1, 0.0  ;;  %v424_v4 = vmax.f32 %v348_v2, 0.0  ;;  %v514_v5 = vpop.f32.mrb[4].mxu0  ;;  %v562_v6 = vpop.f32.mrb[4].mxu1 }
  0xfe   :  { %v515_v7 = vpop.f32.mrb[5].mxu0  ;;  %v563_v8 = vpop.f32.mrb[5].mxu1 }
  0xff   :  { %440 = vst [vmem:[%s1032_s3 + $0x8] sm:$0xff] %v408_v3  ;;  %456 = vst [vmem:[%s1032_s3 + $0x88] sm:$0xff] %v424_v4  ;;  %v516_v9 = vadd.f32 %v515_v7, %v514_v5  ;;  %v564_v10 = vadd.f32 %v563_v8, %v562_v6  ;;  %v517_v11 = vpop.f32.mrb[6].mxu0  ;;  %v565_v12 = vpop.f32.mrb[6].mxu1 }
 0x100   :  { %v518_v13 = vpop.f32.mrb[7].mxu0  ;;  %v566_v14 = vpop.f32.mrb[7].mxu1 }
 0x101   :  { %v289_v15 = vadd.f32 %v516_v9, %v899_v50  ;;  %v353_v16 = vadd.f32 %v564_v10, %v899_v50  ;;  %v519_v17 = vadd.f32 %v518_v13, %v517_v11  ;;  %v567_v18 = vadd.f32 %v566_v14, %v565_v12 }
 0x103   :  { %v409_v19 = vmax.f32 %v289_v15, 0.0  ;;  %v425_v20 = vmax.f32 %v353_v16, 0.0  ;;  %v292_v21 = vadd.f32 %v519_v17, %v899_v50  ;;  %v356_v22 = vadd.f32 %v567_v18, %v899_v50 }
 0x105   :  { %441 = vst [vmem:[%s1032_s3 + $0x10] sm:$0xff] %v409_v19  ;;  %457 = vst [vmem:[%s1032_s3 + $0x90] sm:$0xff] %v425_v20  ;;  %v410_v23 = vmax.f32 %v292_v21, 0.0  ;;  %v426_v24 = vmax.f32 %v356_v22, 0.0  ;;  %v520_v25 = vpop.f32.mrb[8].mxu0  ;;  %v568_v26 = vpop.f32.mrb[8].mxu1 }
 0x106   :  { %v521_v27 = vpop.f32.mrb[9].mxu0  ;;  %v569_v28 = vpop.f32.mrb[9].mxu1 }
 0x107   :  { %442 = vst [vmem:[%s1032_s3 + $0x18] sm:$0xff] %v410_v23  ;;  %458 = vst [vmem:[%s1032_s3 + $0x98] sm:$0xff] %v426_v24  ;;  %v522_v29 = vadd.f32 %v521_v27, %v520_v25  ;;  %v570_v30 = vadd.f32 %v569_v28, %v568_v26  ;;  %v523_v31 = vpop.f32.mrb[10].mxu0  ;;  %v571_v32 = vpop.f32.mrb[10].mxu1 }
 0x108   :  { %v524_v33 = vpop.f32.mrb[11].mxu0  ;;  %v572_v34 = vpop.f32.mrb[11].mxu1 }
 0x109   :  { %v297_v35 = vadd.f32 %v522_v29, %v899_v50  ;;  %v361_v36 = vadd.f32 %v570_v30, %v899_v50  ;;  %v525_v37 = vadd.f32 %v524_v33, %v523_v31  ;;  %v573_v38 = vadd.f32 %v572_v34, %v571_v32 }
 0x10b   :  { %v411_v39 = vmax.f32 %v297_v35, 0.0  ;;  %v427_v40 = vmax.f32 %v361_v36, 0.0  ;;  %v300_v41 = vadd.f32 %v525_v37, %v899_v50  ;;  %v364_v42 = vadd.f32 %v573_v38, %v899_v50 }
 0x10d   :  { %443 = vst [vmem:[%s1032_s3 + $0x20] sm:$0xff] %v411_v39  ;;  %459 = vst [vmem:[%s1032_s3 + $0xa0] sm:$0xff] %v427_v40  ;;  %v412_v43 = vmax.f32 %v300_v41, 0.0  ;;  %v428_v44 = vmax.f32 %v364_v42, 0.0  ;;  %v526_v45 = vpop.f32.mrb[12].mxu0  ;;  %v574_v46 = vpop.f32.mrb[12].mxu1 }
 0x10e   :  { %v527_v47 = vpop.f32.mrb[13].mxu0  ;;  %v575_v48 = vpop.f32.mrb[13].mxu1 }
 0x10f   :  { %444 = vst [vmem:[%s1032_s3 + $0x28] sm:$0xff] %v412_v43  ;;  %460 = vst [vmem:[%s1032_s3 + $0xa8] sm:$0xff] %v428_v44  ;;  %v528_v49 = vadd.f32 %v527_v47, %v526_v45  ;;  %v576_v51 = vadd.f32 %v575_v48, %v574_v46  ;;  %v529_v52 = vpop.f32.mrb[14].mxu0  ;;  %v577_v53 = vpop.f32.mrb[14].mxu1 }
 0x110   :  { %v530_v54 = vpop.f32.mrb[15].mxu0  ;;  %v578_v55 = vpop.f32.mrb[15].mxu1 }
 0x111   :  { %v305_v56 = vadd.f32 %v528_v49, %v899_v50  ;;  %v369_v57 = vadd.f32 %v576_v51, %v899_v50  ;;  %v531_v58 = vadd.f32 %v530_v54, %v529_v52  ;;  %v579_v59 = vadd.f32 %v578_v55, %v577_v53 }
 0x113   :  { %v413_v60 = vmax.f32 %v305_v56, 0.0  ;;  %v429_v61 = vmax.f32 %v369_v57, 0.0  ;;  %v308_v62 = vadd.f32 %v531_v58, %v899_v50  ;;  %v372_v63 = vadd.f32 %v579_v59, %v899_v50 }
 0x115   :  { %445 = vst [vmem:[%s1032_s3 + $0x30] sm:$0xff] %v413_v60  ;;  %461 = vst [vmem:[%s1032_s3 + $0xb0] sm:$0xff] %v429_v61  ;;  %v414_v0 = vmax.f32 %v308_v62, 0.0  ;;  %v430_v1 = vmax.f32 %v372_v63, 0.0  ;;  %v532_v2 = vpop.f32.mrb[16].mxu0  ;;  %v580_v3 = vpop.f32.mrb[16].mxu1 }
 0x116   :  { %v533_v4 = vpop.f32.mrb[17].mxu0  ;;  %v581_v5 = vpop.f32.mrb[17].mxu1 }
 0x117   :  { %446 = vst [vmem:[%s1032_s3 + $0x38] sm:$0xff] %v414_v0  ;;  %462 = vst [vmem:[%s1032_s3 + $0xb8] sm:$0xff] %v430_v1  ;;  %v534_v6 = vadd.f32 %v533_v4, %v532_v2  ;;  %v582_v7 = vadd.f32 %v581_v5, %v580_v3  ;;  %v535_v8 = vpop.f32.mrb[18].mxu0  ;;  %v583_v9 = vpop.f32.mrb[18].mxu1 }
 0x118   :  { %v536_v10 = vpop.f32.mrb[19].mxu0  ;;  %v584_v11 = vpop.f32.mrb[19].mxu1 }
 0x119   :  { %v313_v12 = vadd.f32 %v534_v6, %v899_v50  ;;  %v377_v13 = vadd.f32 %v582_v7, %v899_v50  ;;  %v537_v14 = vadd.f32 %v536_v10, %v535_v8  ;;  %v585_v15 = vadd.f32 %v584_v11, %v583_v9 }
 0x11b   :  { %v415_v16 = vmax.f32 %v313_v12, 0.0  ;;  %v431_v17 = vmax.f32 %v377_v13, 0.0  ;;  %v316_v18 = vadd.f32 %v537_v14, %v899_v50  ;;  %v380_v19 = vadd.f32 %v585_v15, %v899_v50 }
 0x11d   :  { %447 = vst [vmem:[%s1032_s3 + $0x40] sm:$0xff] %v415_v16  ;;  %463 = vst [vmem:[%s1032_s3 + $0xc0] sm:$0xff] %v431_v17  ;;  %v416_v20 = vmax.f32 %v316_v18, 0.0  ;;  %v432_v21 = vmax.f32 %v380_v19, 0.0  ;;  %v538_v22 = vpop.f32.mrb[20].mxu0  ;;  %v586_v23 = vpop.f32.mrb[20].mxu1 }
 0x11e   :  { %v539_v24 = vpop.f32.mrb[21].mxu0  ;;  %v587_v25 = vpop.f32.mrb[21].mxu1 }
 0x11f   :  { %448 = vst [vmem:[%s1032_s3 + $0x48] sm:$0xff] %v416_v20  ;;  %464 = vst [vmem:[%s1032_s3 + $0xc8] sm:$0xff] %v432_v21  ;;  %v540_v26 = vadd.f32 %v539_v24, %v538_v22  ;;  %v588_v27 = vadd.f32 %v587_v25, %v586_v23  ;;  %v541_v28 = vpop.f32.mrb[22].mxu0  ;;  %v589_v29 = vpop.f32.mrb[22].mxu1 }
 0x120   :  { %v542_v30 = vpop.f32.mrb[23].mxu0  ;;  %v590_v31 = vpop.f32.mrb[23].mxu1 }
 0x121   :  { %v321_v32 = vadd.f32 %v540_v26, %v899_v50  ;;  %v385_v33 = vadd.f32 %v588_v27, %v899_v50  ;;  %v543_v34 = vadd.f32 %v542_v30, %v541_v28  ;;  %v591_v35 = vadd.f32 %v590_v31, %v589_v29 }
 0x123   :  { %v417_v36 = vmax.f32 %v321_v32, 0.0  ;;  %v433_v37 = vmax.f32 %v385_v33, 0.0  ;;  %v324_v38 = vadd.f32 %v543_v34, %v899_v50  ;;  %v388_v39 = vadd.f32 %v591_v35, %v899_v50 }
 0x125   :  { %449 = vst [vmem:[%s1032_s3 + $0x50] sm:$0xff] %v417_v36  ;;  %465 = vst [vmem:[%s1032_s3 + $0xd0] sm:$0xff] %v433_v37  ;;  %v418_v40 = vmax.f32 %v324_v38, 0.0  ;;  %v434_v41 = vmax.f32 %v388_v39, 0.0  ;;  %v544_v42 = vpop.f32.mrb[24].mxu0  ;;  %v592_v43 = vpop.f32.mrb[24].mxu1 }
 0x126   :  { %v545_v44 = vpop.f32.mrb[25].mxu0  ;;  %v593_v45 = vpop.f32.mrb[25].mxu1 }
 0x127   :  { %450 = vst [vmem:[%s1032_s3 + $0x58] sm:$0xff] %v418_v40  ;;  %466 = vst [vmem:[%s1032_s3 + $0xd8] sm:$0xff] %v434_v41  ;;  %v546_v46 = vadd.f32 %v545_v44, %v544_v42  ;;  %v594_v47 = vadd.f32 %v593_v45, %v592_v43  ;;  %v547_v48 = vpop.f32.mrb[26].mxu0  ;;  %v595_v49 = vpop.f32.mrb[26].mxu1 }
 0x128   :  { %v548_v51 = vpop.f32.mrb[27].mxu0  ;;  %v596_v52 = vpop.f32.mrb[27].mxu1 }
 0x129   :  { %v329_v53 = vadd.f32 %v546_v46, %v899_v50  ;;  %v393_v54 = vadd.f32 %v594_v47, %v899_v50  ;;  %v549_v55 = vadd.f32 %v548_v51, %v547_v48  ;;  %v597_v56 = vadd.f32 %v596_v52, %v595_v49 }
 0x12b   :  { %v419_v57 = vmax.f32 %v329_v53, 0.0  ;;  %v435_v58 = vmax.f32 %v393_v54, 0.0  ;;  %v332_v59 = vadd.f32 %v549_v55, %v899_v50  ;;  %v396_v60 = vadd.f32 %v597_v56, %v899_v50 }
 0x12d   :  { %451 = vst [vmem:[%s1032_s3 + $0x60] sm:$0xff] %v419_v57  ;;  %467 = vst [vmem:[%s1032_s3 + $0xe0] sm:$0xff] %v435_v58  ;;  %v420_v61 = vmax.f32 %v332_v59, 0.0  ;;  %v436_v62 = vmax.f32 %v396_v60, 0.0  ;;  %v550_v63 = vpop.f32.mrb[28].mxu0  ;;  %v598_v0 = vpop.f32.mrb[28].mxu1 }
 0x12e   :  { %v551_v1 = vpop.f32.mrb[29].mxu0  ;;  %v599_v2 = vpop.f32.mrb[29].mxu1 }
 0x12f   :  { %452 = vst [vmem:[%s1032_s3 + $0x68] sm:$0xff] %v420_v61  ;;  %468 = vst [vmem:[%s1032_s3 + $0xe8] sm:$0xff] %v436_v62  ;;  %v552_v3 = vadd.f32 %v551_v1, %v550_v63  ;;  %v600_v4 = vadd.f32 %v599_v2, %v598_v0  ;;  %v553_v5 = vpop.f32.mrb[30].mxu0  ;;  %v601_v6 = vpop.f32.mrb[30].mxu1 }
 0x130   :  { %v554_v7 = vpop.f32.mrb[31].mxu0  ;;  %v602_v8 = vpop.f32.mrb[31].mxu1 }
 0x131   :  { %v337_v9 = vadd.f32 %v552_v3, %v899_v50  ;;  %v401_v10 = vadd.f32 %v600_v4, %v899_v50  ;;  %v555_v11 = vadd.f32 %v554_v7, %v553_v5  ;;  %v603_v12 = vadd.f32 %v602_v8, %v601_v6 }
 0x133   :  { %v421_v13 = vmax.f32 %v337_v9, 0.0  ;;  %v437_v14 = vmax.f32 %v401_v10, 0.0  ;;  %v340_v15 = vadd.f32 %v555_v11, %v899_v50  ;;  %v404_v16 = vadd.f32 %v603_v12, %v899_v50 }
 0x135   :  { %453 = vst [vmem:[%s1032_s3 + $0x70] sm:$0xff] %v421_v13  ;;  %469 = vst [vmem:[%s1032_s3 + $0xf0] sm:$0xff] %v437_v14  ;;  %v422_v17 = vmax.f32 %v340_v15, 0.0  ;;  %v438_v18 = vmax.f32 %v404_v16, 0.0 }
 0x137   :  { %454 = vst [vmem:[%s1032_s3 + $0x78] sm:$0xff] %v422_v17  ;;  %470 = vst [vmem:[%s1032_s3 + $0xf8] sm:$0xff] %v438_v18 }

// kernel: model_forward.9
= control target key start
LH: loop header
LB: loop body
LE: loop exit
PB: predicated region body
PF: predicated region fallthrough
CT: control target
= control target key end

     0   :  { %s868_s12 = smov 0   ;;  %s1074_s0 = inlined_call_operand.vmem [shape: f32[1024,256], index: 0, kind: input, shape index: {}]   ;;  %s1075_s1 = inlined_call_operand.vmem [shape: bf16[256,128], index: 1, kind: input, shape index: {}]   ;;  %s1076_s2 = inlined_call_operand.vmem [shape: f32[1,128], index: 2, kind: input, shape index: {}]   ;;  %s1077_s3 = inlined_call_operand.vmem [shape: f32[1024,128], index: 3, kind: output, shape index: {}]  }
   0x1 LB: > { %s658_s13 = sadd.s32 4294967295, %s846_s12   ;;  %p662_p0 = scmp.ge.s32.totalorder %s846_s12, 1  ;;  %s846_s12 = sphi %s868_s12, %s13_s12  }
   0x2   : > { %p139_p1 = scmp.lt.s32.totalorder %s846_s12, 5 }
   0x4   : > { %p140_p2 = pnand %p662_p0, %p139_p1 }
   0x5   : > { %v824_v0 = vld [vmem:[%s1075_s1 + $0x40] sm:$0xff] (!%p140_p2)   ;;  %s663_s16 = sshll.u32 (!%p140_p2), %s658_s13, 5  ;;  %v826_v2 = vld [vmem:[%s1075_s1 + $0x48] sm:$0xff] (!%p140_p2)   ;;  %v828_v4 = vld [vmem:[%s1075_s1 + $0x50] sm:$0xff] (!%p140_p2)  }
   0x6   : > { %143 = sbr.rel (%p140_p2) target bundleno = 314 (0x13a), region = 32  ;;  %v825_v1 = vld [vmem:[%s1075_s1] sm:$0xff] (!%p140_p2)   ;;  %688 = vmatprep.subr.bf16.mxu0 (!%p140_p2), %v824_v0  ;;  %800 = vmatprep.subr.bf16.mxu1 (!%p140_p2), %v824_v0  ;;  %p165_p3 = scmp.lt.s32.totalorder (!%p140_p2), %s663_s16, 127  ;;  %v827_v3 = vld [vmem:[%s1075_s1 + $0x8] sm:$0xff] (!%p140_p2)   ;;  %v829_v5 = vld [vmem:[%s1075_s1 + $0x10] sm:$0xff] (!%p140_p2)  }
   0x7   : > { %689 = vmatpush3.bf16.msra.mxu0 (!%p140_p2), %v825_v1  ;;  %808 = vmatpush3.bf16.msra.mxu1 (!%p140_p2), %v825_v1  ;;  %v830_v6 = vld [vmem:[%s1075_s1 + $0x58] sm:$0xff] (!%p140_p2)   ;;  %v832_v8 = vld [vmem:[%s1075_s1 + $0x60] sm:$0xff] (!%p140_p2)   ;;  %v834_v10 = vld [vmem:[%s1075_s1 + $0x68] sm:$0xff] (!%p140_p2)  }
   0x8   : > { %690 = vmatprep.subr.bf16.mxu0 (!%p140_p2), %v826_v2  ;;  %801 = vmatprep.subr.bf16.mxu1 (!%p140_p2), %v826_v2  ;;  %v831_v7 = vld [vmem:[%s1075_s1 + $0x18] sm:$0xff] (!%p140_p2)   ;;  %v833_v9 = vld [vmem:[%s1075_s1 + $0x20] sm:$0xff] (!%p140_p2)   ;;  %v835_v17 = vld [vmem:[%s1075_s1 + $0x28] sm:$0xff] (!%p140_p2)  }
   0x9   : > { %v836_v18 = vld [vmem:[%s1075_s1 + $0x70] sm:$0xff] (!%p140_p2)   ;;  %v838_v20 = vld [vmem:[%s1075_s1 + $0x78] sm:$0xff] (!%p140_p2)  }
   0xa   : > { %v837_v19 = vld [vmem:[%s1075_s1 + $0x30] sm:$0xff] (!%p140_p2)   ;;  %v839_v21 = vld [vmem:[%s1075_s1 + $0x38] sm:$0xff] (!%p140_p2)  }
   0xb   : > { %691 = vmatpush3.bf16.msra.mxu0 (!%p140_p2), %v827_v3  ;;  %809 = vmatpush3.bf16.msra.mxu1 (!%p140_p2), %v827_v3 }
   0xc   : > { %692 = vmatprep.subr.bf16.mxu0 (!%p140_p2), %v828_v4  ;;  %802 = vmatprep.subr.bf16.mxu1 (!%p140_p2), %v828_v4 }
   0xd   : > { %s1079_s16 = smov (!%p165_p3, %s663_s16), 127 }
   0xe   : > { %s687_s29 = sshll.u32 %s1079_s16, 4  ;;  %s667_s26 = sshll.u32 %s1079_s16, 3 }
   0xf   : > { %693 = vmatpush3.bf16.msra.mxu0 %v829_v5  ;;  %810 = vmatpush3.bf16.msra.mxu1 %v829_v5  ;;  %s909_s9 = scalar_lea.vmem %s1074_s0, %s687_s29  ;;  %s1005_s4 = scalar_lea.vmem %s1077_s3, %s667_s26 }
  0x10   : > { %694 = vmatprep.subr.bf16.mxu0 %v830_v6  ;;  %803 = vmatprep.subr.bf16.mxu1 %v830_v6  ;;  %v179_v11 = vld [vmem:[%s909_s9 + $0x8] sm:$0xff]  ;;  %v181_v12 = vld [vmem:[%s909_s9 + $0x18] sm:$0xff]  ;;  %v178_v22 = vld [vmem:[%s909_s9] sm:$0xff] }
  0x11   : > { %v211_v13 = vld [vmem:[%s909_s9 + $0x108] sm:$0xff]  ;;  %v243_v14 = vpack.c.bf16 %v181_v12, %v179_v11  ;;  %v213_v15 = vld [vmem:[%s909_s9 + $0x118] sm:$0xff]  ;;  %v180_v23 = vld [vmem:[%s909_s9 + $0x10] sm:$0xff] }
  0x12   : > { %v259_v16 = vpack.c.bf16 %v213_v15, %v211_v13  ;;  %v210_v24 = vld [vmem:[%s909_s9 + $0x100] sm:$0xff]  ;;  %v212_v25 = vld [vmem:[%s909_s9 + $0x110] sm:$0xff]  ;;  %v183_v26 = vld [vmem:[%s909_s9 + $0x28] sm:$0xff]  ;;  %v242_v30 = vpack.c.bf16 %v180_v23, %v178_v22 }
  0x13   : > { %695 = vmatpush3.bf16.msra.mxu0 %v831_v7  ;;  %811 = vmatpush3.bf16.msra.mxu1 %v831_v7  ;;  %v185_v27 = vld [vmem:[%s909_s9 + $0x38] sm:$0xff]  ;;  %v215_v28 = vld [vmem:[%s909_s9 + $0x128] sm:$0xff]  ;;  %v258_v31 = vpack.c.bf16 %v212_v25, %v210_v24  ;;  %v182_v34 = vld [vmem:[%s909_s9 + $0x20] sm:$0xff] }
  0x14   : > { %696 = vmatprep.subr.bf16.mxu0 %v832_v8  ;;  %804 = vmatprep.subr.bf16.mxu1 %v832_v8  ;;  %v217_v29 = vld [vmem:[%s909_s9 + $0x138] sm:$0xff]  ;;  %v245_v32 = vpack.c.bf16 %v185_v27, %v183_v26  ;;  %v184_v35 = vld [vmem:[%s909_s9 + $0x30] sm:$0xff]  ;;  %v214_v36 = vld [vmem:[%s909_s9 + $0x120] sm:$0xff] }
  0x15   : > { %441 = vmatprep.mubr.bf16.mxu0 %v243_v14  ;;  %505 = vmatprep.mubr.bf16.mxu1 %v259_v16  ;;  %v261_v33 = vpack.c.bf16 %v217_v29, %v215_v28  ;;  %v216_v37 = vld [vmem:[%s909_s9 + $0x130] sm:$0xff]  ;;  %v187_v38 = vld [vmem:[%s909_s9 + $0x48] sm:$0xff]  ;;  %v189_v39 = vld [vmem:[%s909_s9 + $0x58] sm:$0xff]  ;;  %v244_v42 = vpack.c.bf16 %v184_v35, %v182_v34 }
  0x16   : > { %v219_v40 = vld [vmem:[%s909_s9 + $0x148] sm:$0xff]  ;;  %v221_v41 = vld [vmem:[%s909_s9 + $0x158] sm:$0xff]  ;;  %v260_v43 = vpack.c.bf16 %v216_v37, %v214_v36  ;;  %v247_v44 = vpack.c.bf16 %v189_v39, %v187_v38  ;;  %v186_v46 = vld [vmem:[%s909_s9 + $0x40] sm:$0xff] }
  0x17   : > { %697 = vmatpush3.bf16.msra.mxu0 %v833_v9  ;;  %812 = vmatpush3.bf16.msra.mxu1 %v833_v9  ;;  %v263_v45 = vpack.c.bf16 %v221_v41, %v219_v40  ;;  %v188_v47 = vld [vmem:[%s909_s9 + $0x50] sm:$0xff]  ;;  %v218_v48 = vld [vmem:[%s909_s9 + $0x140] sm:$0xff]  ;;  %v191_v50 = vld [vmem:[%s909_s9 + $0x68] sm:$0xff] }
  0x18   : > { %698 = vmatprep.subr.bf16.mxu0 %v834_v10  ;;  %805 = vmatprep.subr.bf16.mxu1 %v834_v10  ;;  %v220_v49 = vld [vmem:[%s909_s9 + $0x150] sm:$0xff]  ;;  %v193_v51 = vld [vmem:[%s909_s9 + $0x78] sm:$0xff]  ;;  %v223_v52 = vld [vmem:[%s909_s9 + $0x168] sm:$0xff]  ;;  %v246_v54 = vpack.c.bf16 %v188_v47, %v186_v46 }
  0x19   : > { %v225_v53 = vld [vmem:[%s909_s9 + $0x178] sm:$0xff]  ;;  %v262_v55 = vpack.c.bf16 %v220_v49, %v218_v48  ;;  %v249_v56 = vpack.c.bf16 %v193_v51, %v191_v50  ;;  %v190_v58 = vld [vmem:[%s909_s9 + $0x60] sm:$0xff]  ;;  %v192_v59 = vld [vmem:[%s909_s9 + $0x70] sm:$0xff] }
  0x1a   : > { %v265_v57 = vpack.c.bf16 %v225_v53, %v223_v52  ;;  %v222_v60 = vld [vmem:[%s909_s9 + $0x160] sm:$0xff]  ;;  %v224_v61 = vld [vmem:[%s909_s9 + $0x170] sm:$0xff]  ;;  %v195_v62 = vld [vmem:[%s909_s9 + $0x88] sm:$0xff]  ;;  %v248_v2 = vpack.c.bf16 %v192_v59, %v190_v58 }
  0x1b   : > { %699 = vmatpush3.bf16.msra.mxu0 %v835_v17  ;;  %813 = vmatpush3.bf16.msra.mxu1 %v835_v17  ;;  %v197_v63 = vld [vmem:[%s909_s9 + $0x98] sm:$0xff]  ;;  %v227_v0 = vld [vmem:[%s909_s9 + $0x188] sm:$0xff]  ;;  %v264_v3 = vpack.c.bf16 %v224_v61, %v222_v60  ;;  %v194_v6 = vld [vmem:[%s909_s9 + $0x80] sm:$0xff] }
  0x1c   : > { %700 = vmatprep.subr.bf16.mxu0 %v836_v18  ;;  %806 = vmatprep.subr.bf16.mxu1 %v836_v18  ;;  %v229_v1 = vld [vmem:[%s909_s9 + $0x198] sm:$0xff]  ;;  %v251_v4 = vpack.c.bf16 %v197_v63, %v195_v62  ;;  %v196_v7 = vld [vmem:[%s909_s9 + $0x90] sm:$0xff]  ;;  %v226_v8 = vld [vmem:[%s909_s9 + $0x180] sm:$0xff] }
  0x1d   : > { %v267_v5 = vpack.c.bf16 %v229_v1, %v227_v0  ;;  %v228_v9 = vld [vmem:[%s909_s9 + $0x190] sm:$0xff]  ;;  %v199_v10 = vld [vmem:[%s909_s9 + $0xa8] sm:$0xff]  ;;  %v201_v11 = vld [vmem:[%s909_s9 + $0xb8] sm:$0xff]  ;;  %v250_v14 = vpack.c.bf16 %v196_v7, %v194_v6 }
  0x1e   : > { %v231_v12 = vld [vmem:[%s909_s9 + $0x1a8] sm:$0xff]  ;;  %v233_v13 = vld [vmem:[%s909_s9 + $0x1b8] sm:$0xff]  ;;  %v266_v15 = vpack.c.bf16 %v228_v9, %v226_v8  ;;  %v253_v16 = vpack.c.bf16 %v201_v11, %v199_v10  ;;  %v198_v18 = vld [vmem:[%s909_s9 + $0xa0] sm:$0xff] }
  0x1f   : > { %701 = vmatpush3.bf16.msra.mxu0 %v837_v19  ;;  %814 = vmatpush3.bf16.msra.mxu1 %v837_v19  ;;  %v269_v17 = vpack.c.bf16 %v233_v13, %v231_v12  ;;  %v200_v19 = vld [vmem:[%s909_s9 + $0xb0] sm:$0xff]  ;;  %v203_v22 = vld [vmem:[%s909_s9 + $0xc8] sm:$0xff]  ;;  %v205_v23 = vld [vmem:[%s909_s9 + $0xd8] sm:$0xff] }
  0x20   : > { %702 = vmatprep.subr.bf16.mxu0 %v838_v20  ;;  %807 = vmatprep.subr.bf16.mxu1 %v838_v20  ;;  %v230_v20 = vld [vmem:[%s909_s9 + $0x1a0] sm:$0xff]  ;;  %v235_v24 = vld [vmem:[%s909_s9 + $0x1c8] sm:$0xff]  ;;  %v237_v25 = vld [vmem:[%s909_s9 + $0x1d8] sm:$0xff]  ;;  %v252_v26 = vpack.c.bf16 %v200_v19, %v198_v18  ;;  %v255_v28 = vpack.c.bf16 %v205_v23, %v203_v22 }
  0x21   : > { %v271_v29 = vpack.c.bf16 %v237_v25, %v235_v24  ;;  %v207_v34 = vld [vmem:[%s909_s9 + $0xe8] sm:$0xff]  ;;  %v209_v35 = vld [vmem:[%s909_s9 + $0xf8] sm:$0xff]  ;;  %v1000_v50 = vld [vmem:[%s1076_s2] ss:$0 sm:$0xff] }
  0x22   : > { %v239_v36 = vld [vmem:[%s909_s9 + $0x1e8] sm:$0xff]  ;;  %v241_v37 = vld [vmem:[%s909_s9 + $0x1f8] sm:$0xff]  ;;  %v257_v40 = vpack.c.bf16 %v209_v35, %v207_v34 }
  0x23   : > { %703 = vmatpush3.bf16.msra.mxu0 %v839_v21  ;;  %815 = vmatpush3.bf16.msra.mxu1 %v839_v21  ;;  %v232_v21 = vld [vmem:[%s909_s9 + $0x1b0] sm:$0xff]  ;;  %v273_v41 = vpack.c.bf16 %v241_v37, %v239_v36 }
  0x24   : > { %v268_v27 = vpack.c.bf16 %v232_v21, %v230_v20 }
  0x26   : > { %442 = vmatmul.mubr.bf16.vlgmr.msra.gmra.mrb[0].mxu0 %v242_v30  ;;  %506 = vmatmul.mubr.bf16.vlgmr.msra.gmra.mrb[0].mxu1 %v258_v31  ;;  %v202_v30 = vld [vmem:[%s909_s9 + $0xc0] sm:$0xff]  ;;  %v204_v31 = vld [vmem:[%s909_s9 + $0xd0] sm:$0xff] }
  0x27   : > { %449 = vmatprep.mubr.bf16.mxu0 %v245_v32  ;;  %513 = vmatprep.mubr.bf16.mxu1 %v261_v33  ;;  %v234_v32 = vld [vmem:[%s909_s9 + $0x1c0] sm:$0xff]  ;;  %v236_v33 = vld [vmem:[%s909_s9 + $0x1d0] sm:$0xff]  ;;  %v254_v38 = vpack.c.bf16 %v204_v31, %v202_v30 }
  0x28   : > { %v270_v39 = vpack.c.bf16 %v236_v33, %v234_v32 }
  0x2e   : > { %450 = vmatmul.mubr.bf16.gmra.mrb[4].mxu0 %v244_v42  ;;  %514 = vmatmul.mubr.bf16.gmra.mrb[4].mxu1 %v260_v43  ;;  %v206_v42 = vld [vmem:[%s909_s9 + $0xe0] sm:$0xff]  ;;  %v208_v43 = vld [vmem:[%s909_s9 + $0xf0] sm:$0xff] }
  0x2f   : > { %457 = vmatprep.mubr.bf16.mxu0 %v247_v44  ;;  %521 = vmatprep.mubr.bf16.mxu1 %v263_v45  ;;  %v238_v44 = vld [vmem:[%s909_s9 + $0x1e0] sm:$0xff]  ;;  %v240_v45 = vld [vmem:[%s909_s9 + $0x1f0] sm:$0xff]  ;;  %v256_v46 = vpack.c.bf16 %v208_v43, %v206_v42 }
  0x30   : > { %v272_v47 = vpack.c.bf16 %v240_v45, %v238_v44 }
  0x36   : > { %458 = vmatmul.mubr.bf16.gmra.mrb[8].mxu0 %v246_v54  ;;  %522 = vmatmul.mubr.bf16.gmra.mrb[8].mxu1 %v262_v55 }
  0x37   : > { %465 = vmatprep.mubr.bf16.mxu0 %v249_v56  ;;  %529 = vmatprep.mubr.bf16.mxu1 %v265_v57 }
  0x3e   : > { %466 = vmatmul.mubr.bf16.gmra.mrb[12].mxu0 %v248_v2  ;;  %530 = vmatmul.mubr.bf16.gmra.mrb[12].mxu1 %v264_v3 }
  0x3f   : > { %473 = vmatprep.mubr.bf16.mxu0 %v251_v4  ;;  %537 = vmatprep.mubr.bf16.mxu1 %v267_v5 }
  0x46   : > { %474 = vmatmul.mubr.bf16.gmra.mrb[16].mxu0 %v250_v14  ;;  %538 = vmatmul.mubr.bf16.gmra.mrb[16].mxu1 %v266_v15 }
  0x47   : > { %481 = vmatprep.mubr.bf16.mxu0 %v253_v16  ;;  %545 = vmatprep.mubr.bf16.mxu1 %v269_v17 }
  0x4e   : > { %482 = vmatmul.mubr.bf16.gmra.mrb[20].mxu0 %v252_v26  ;;  %546 = vmatmul.mubr.bf16.gmra.mrb[20].mxu1 %v268_v27 }
  0x4f   : > { %489 = vmatprep.mubr.bf16.mxu0 %v255_v28  ;;  %553 = vmatprep.mubr.bf16.mxu1 %v271_v29 }
  0x56   : > { %490 = vmatmul.mubr.bf16.gmra.mrb[24].mxu0 %v254_v38  ;;  %554 = vmatmul.mubr.bf16.gmra.mrb[24].mxu1 %v270_v39 }
  0x57   : > { %497 = vmatprep.mubr.bf16.mxu0 %v257_v40  ;;  %561 = vmatprep.mubr.bf16.mxu1 %v273_v41 }
  0x5e   : > { %498 = vmatmul.mubr.bf16.gmra.mrb[28].mxu0 %v256_v46  ;;  %562 = vmatmul.mubr.bf16.gmra.mrb[28].mxu1 %v272_v47 }
  0xf9   : > { %v704_v48 = vpop.f32.mrb[0].mxu0  ;;  %v752_v49 = vpop.f32.mrb[0].mxu1 }
  0xfa   : > { %v705_v51 = vpop.f32.mrb[1].mxu0  ;;  %v753_v52 = vpop.f32.mrb[1].mxu1 }
  0xfb   : > { %v706_v53 = vadd.f32 %v705_v51, %v704_v48  ;;  %v754_v54 = vadd.f32 %v753_v52, %v752_v49  ;;  %v707_v55 = vpop.f32.mrb[2].mxu0  ;;  %v755_v56 = vpop.f32.mrb[2].mxu1 }
  0xfc   : > { %v708_v57 = vpop.f32.mrb[3].mxu0  ;;  %v756_v58 = vpop.f32.mrb[3].mxu1 }
  0xfd   : > { %v444_v59 = vadd.f32 %v706_v53, %v1000_v50  ;;  %v508_v60 = vadd.f32 %v754_v54, %v1000_v50  ;;  %v709_v61 = vadd.f32 %v708_v57, %v707_v55  ;;  %v757_v62 = vadd.f32 %v756_v58, %v755_v56 }
  0xff   : > { %570 = vst [vmem:[%s1005_s4] sm:$0xff] %v444_v59  ;;  %586 = vst [vmem:[%s1005_s4 + $0x80] sm:$0xff] %v508_v60  ;;  %v447_v63 = vadd.f32 %v709_v61, %v1000_v50  ;;  %v511_v0 = vadd.f32 %v757_v62, %v1000_v50 }
 0x101   : > { %571 = vst [vmem:[%s1005_s4 + $0x8] sm:$0xff] %v447_v63  ;;  %587 = vst [vmem:[%s1005_s4 + $0x88] sm:$0xff] %v511_v0  ;;  %v710_v1 = vpop.f32.mrb[4].mxu0  ;;  %v758_v2 = vpop.f32.mrb[4].mxu1 }
 0x102   : > { %v711_v3 = vpop.f32.mrb[5].mxu0  ;;  %v759_v4 = vpop.f32.mrb[5].mxu1 }
 0x103   : > { %v712_v5 = vadd.f32 %v711_v3, %v710_v1  ;;  %v760_v6 = vadd.f32 %v759_v4, %v758_v2  ;;  %v713_v7 = vpop.f32.mrb[6].mxu0  ;;  %v761_v8 = vpop.f32.mrb[6].mxu1 }
 0x104   : > { %v714_v9 = vpop.f32.mrb[7].mxu0  ;;  %v762_v10 = vpop.f32.mrb[7].mxu1 }
 0x105   : > { %v452_v11 = vadd.f32 %v712_v5, %v1000_v50  ;;  %v516_v12 = vadd.f32 %v760_v6, %v1000_v50  ;;  %v715_v13 = vadd.f32 %v714_v9, %v713_v7  ;;  %v763_v14 = vadd.f32 %v762_v10, %v761_v8 }
 0x107   : > { %572 = vst [vmem:[%s1005_s4 + $0x10] sm:$0xff] %v452_v11  ;;  %588 = vst [vmem:[%s1005_s4 + $0x90] sm:$0xff] %v516_v12  ;;  %v455_v15 = vadd.f32 %v715_v13, %v1000_v50  ;;  %v519_v16 = vadd.f32 %v763_v14, %v1000_v50 }
 0x109   : > { %573 = vst [vmem:[%s1005_s4 + $0x18] sm:$0xff] %v455_v15  ;;  %589 = vst [vmem:[%s1005_s4 + $0x98] sm:$0xff] %v519_v16  ;;  %v716_v17 = vpop.f32.mrb[8].mxu0  ;;  %v764_v18 = vpop.f32.mrb[8].mxu1 }
 0x10a   : > { %v717_v19 = vpop.f32.mrb[9].mxu0  ;;  %v765_v20 = vpop.f32.mrb[9].mxu1 }
 0x10b   : > { %v718_v21 = vadd.f32 %v717_v19, %v716_v17  ;;  %v766_v22 = vadd.f32 %v765_v20, %v764_v18  ;;  %v719_v23 = vpop.f32.mrb[10].mxu0  ;;  %v767_v24 = vpop.f32.mrb[10].mxu1 }
 0x10c   : > { %v720_v25 = vpop.f32.mrb[11].mxu0  ;;  %v768_v26 = vpop.f32.mrb[11].mxu1 }
 0x10d   : > { %v460_v27 = vadd.f32 %v718_v21, %v1000_v50  ;;  %v524_v28 = vadd.f32 %v766_v22, %v1000_v50  ;;  %v721_v29 = vadd.f32 %v720_v25, %v719_v23  ;;  %v769_v30 = vadd.f32 %v768_v26, %v767_v24 }
 0x10f   : > { %574 = vst [vmem:[%s1005_s4 + $0x20] sm:$0xff] %v460_v27  ;;  %590 = vst [vmem:[%s1005_s4 + $0xa0] sm:$0xff] %v524_v28  ;;  %v463_v31 = vadd.f32 %v721_v29, %v1000_v50  ;;  %v527_v32 = vadd.f32 %v769_v30, %v1000_v50 }
 0x111   : > { %575 = vst [vmem:[%s1005_s4 + $0x28] sm:$0xff] %v463_v31  ;;  %591 = vst [vmem:[%s1005_s4 + $0xa8] sm:$0xff] %v527_v32  ;;  %v722_v33 = vpop.f32.mrb[12].mxu0  ;;  %v770_v34 = vpop.f32.mrb[12].mxu1 }
 0x112   : > { %v723_v35 = vpop.f32.mrb[13].mxu0  ;;  %v771_v36 = vpop.f32.mrb[13].mxu1 }
 0x113   : > { %v724_v37 = vadd.f32 %v723_v35, %v722_v33  ;;  %v772_v38 = vadd.f32 %v771_v36, %v770_v34  ;;  %v725_v39 = vpop.f32.mrb[14].mxu0  ;;  %v773_v40 = vpop.f32.mrb[14].mxu1 }
 0x114   : > { %v726_v41 = vpop.f32.mrb[15].mxu0  ;;  %v774_v42 = vpop.f32.mrb[15].mxu1 }
 0x115   : > { %v468_v43 = vadd.f32 %v724_v37, %v1000_v50  ;;  %v532_v44 = vadd.f32 %v772_v38, %v1000_v50  ;;  %v727_v45 = vadd.f32 %v726_v41, %v725_v39  ;;  %v775_v46 = vadd.f32 %v774_v42, %v773_v40 }
 0x117   : > { %576 = vst [vmem:[%s1005_s4 + $0x30] sm:$0xff] %v468_v43  ;;  %592 = vst [vmem:[%s1005_s4 + $0xb0] sm:$0xff] %v532_v44  ;;  %v471_v47 = vadd.f32 %v727_v45, %v1000_v50  ;;  %v535_v48 = vadd.f32 %v775_v46, %v1000_v50 }
 0x119   : > { %577 = vst [vmem:[%s1005_s4 + $0x38] sm:$0xff] %v471_v47  ;;  %593 = vst [vmem:[%s1005_s4 + $0xb8] sm:$0xff] %v535_v48  ;;  %v728_v49 = vpop.f32.mrb[16].mxu0  ;;  %v776_v51 = vpop.f32.mrb[16].mxu1 }
 0x11a   : > { %v729_v52 = vpop.f32.mrb[17].mxu0  ;;  %v777_v53 = vpop.f32.mrb[17].mxu1 }
 0x11b   : > { %v730_v54 = vadd.f32 %v729_v52, %v728_v49  ;;  %v778_v55 = vadd.f32 %v777_v53, %v776_v51  ;;  %v731_v56 = vpop.f32.mrb[18].mxu0  ;;  %v779_v57 = vpop.f32.mrb[18].mxu1 }
 0x11c   : > { %v732_v58 = vpop.f32.mrb[19].mxu0  ;;  %v780_v59 = vpop.f32.mrb[19].mxu1 }
 0x11d   : > { %v476_v60 = vadd.f32 %v730_v54, %v1000_v50  ;;  %v540_v61 = vadd.f32 %v778_v55, %v1000_v50  ;;  %v733_v62 = vadd.f32 %v732_v58, %v731_v56  ;;  %v781_v63 = vadd.f32 %v780_v59, %v779_v57 }
 0x11f   : > { %578 = vst [vmem:[%s1005_s4 + $0x40] sm:$0xff] %v476_v60  ;;  %594 = vst [vmem:[%s1005_s4 + $0xc0] sm:$0xff] %v540_v61  ;;  %v479_v0 = vadd.f32 %v733_v62, %v1000_v50  ;;  %v543_v1 = vadd.f32 %v781_v63, %v1000_v50 }
 0x121   : > { %579 = vst [vmem:[%s1005_s4 + $0x48] sm:$0xff] %v479_v0  ;;  %595 = vst [vmem:[%s1005_s4 + $0xc8] sm:$0xff] %v543_v1  ;;  %v734_v2 = vpop.f32.mrb[20].mxu0  ;;  %v782_v3 = vpop.f32.mrb[20].mxu1 }
 0x122   : > { %v735_v4 = vpop.f32.mrb[21].mxu0  ;;  %v783_v5 = vpop.f32.mrb[21].mxu1 }
 0x123   : > { %v736_v6 = vadd.f32 %v735_v4, %v734_v2  ;;  %v784_v7 = vadd.f32 %v783_v5, %v782_v3  ;;  %v737_v8 = vpop.f32.mrb[22].mxu0  ;;  %v785_v9 = vpop.f32.mrb[22].mxu1 }
 0x124   : > { %v738_v10 = vpop.f32.mrb[23].mxu0  ;;  %v786_v11 = vpop.f32.mrb[23].mxu1 }
 0x125   : > { %v484_v12 = vadd.f32 %v736_v6, %v1000_v50  ;;  %v548_v13 = vadd.f32 %v784_v7, %v1000_v50  ;;  %v739_v14 = vadd.f32 %v738_v10, %v737_v8  ;;  %v787_v15 = vadd.f32 %v786_v11, %v785_v9 }
 0x127   : > { %580 = vst [vmem:[%s1005_s4 + $0x50] sm:$0xff] %v484_v12  ;;  %596 = vst [vmem:[%s1005_s4 + $0xd0] sm:$0xff] %v548_v13  ;;  %v487_v16 = vadd.f32 %v739_v14, %v1000_v50  ;;  %v551_v17 = vadd.f32 %v787_v15, %v1000_v50 }
 0x129   : > { %581 = vst [vmem:[%s1005_s4 + $0x58] sm:$0xff] %v487_v16  ;;  %597 = vst [vmem:[%s1005_s4 + $0xd8] sm:$0xff] %v551_v17  ;;  %v740_v18 = vpop.f32.mrb[24].mxu0  ;;  %v788_v19 = vpop.f32.mrb[24].mxu1 }
 0x12a   : > { %v741_v20 = vpop.f32.mrb[25].mxu0  ;;  %v789_v21 = vpop.f32.mrb[25].mxu1 }
 0x12b   : > { %v742_v22 = vadd.f32 %v741_v20, %v740_v18  ;;  %v790_v23 = vadd.f32 %v789_v21, %v788_v19  ;;  %v743_v24 = vpop.f32.mrb[26].mxu0  ;;  %v791_v25 = vpop.f32.mrb[26].mxu1 }
 0x12c   : > { %v744_v26 = vpop.f32.mrb[27].mxu0  ;;  %v792_v27 = vpop.f32.mrb[27].mxu1 }
 0x12d   : > { %v492_v28 = vadd.f32 %v742_v22, %v1000_v50  ;;  %v556_v29 = vadd.f32 %v790_v23, %v1000_v50  ;;  %v745_v30 = vadd.f32 %v744_v26, %v743_v24  ;;  %v793_v31 = vadd.f32 %v792_v27, %v791_v25 }
 0x12f   : > { %582 = vst [vmem:[%s1005_s4 + $0x60] sm:$0xff] %v492_v28  ;;  %598 = vst [vmem:[%s1005_s4 + $0xe0] sm:$0xff] %v556_v29  ;;  %v495_v32 = vadd.f32 %v745_v30, %v1000_v50  ;;  %v559_v33 = vadd.f32 %v793_v31, %v1000_v50 }
 0x131   : > { %583 = vst [vmem:[%s1005_s4 + $0x68] sm:$0xff] %v495_v32  ;;  %599 = vst [vmem:[%s1005_s4 + $0xe8] sm:$0xff] %v559_v33  ;;  %v746_v34 = vpop.f32.mrb[28].mxu0  ;;  %v794_v35 = vpop.f32.mrb[28].mxu1 }
 0x132   : > { %v747_v36 = vpop.f32.mrb[29].mxu0  ;;  %v795_v37 = vpop.f32.mrb[29].mxu1 }
 0x133   : > { %v748_v38 = vadd.f32 %v747_v36, %v746_v34  ;;  %v796_v39 = vadd.f32 %v795_v37, %v794_v35  ;;  %v749_v40 = vpop.f32.mrb[30].mxu0  ;;  %v797_v41 = vpop.f32.mrb[30].mxu1 }
 0x134   : > { %v750_v42 = vpop.f32.mrb[31].mxu0  ;;  %v798_v43 = vpop.f32.mrb[31].mxu1 }
 0x135   : > { %v500_v44 = vadd.f32 %v748_v38, %v1000_v50  ;;  %v564_v45 = vadd.f32 %v796_v39, %v1000_v50  ;;  %v751_v46 = vadd.f32 %v750_v42, %v749_v40  ;;  %v799_v47 = vadd.f32 %v798_v43, %v797_v41 }
 0x137   : > { %584 = vst [vmem:[%s1005_s4 + $0x70] sm:$0xff] %v500_v44  ;;  %600 = vst [vmem:[%s1005_s4 + $0xf0] sm:$0xff] %v564_v45  ;;  %v503_v48 = vadd.f32 %v751_v46, %v1000_v50  ;;  %v567_v49 = vadd.f32 %v799_v47, %v1000_v50 }
 0x139   : > { %585 = vst [vmem:[%s1005_s4 + $0x78] sm:$0xff] %v503_v48  ;;  %601 = vst [vmem:[%s1005_s4 + $0xf8] sm:$0xff] %v567_v49 }
 0x13a PF: > { %s13_s12 = sadd.s32 1, %s846_s12  }
 0x13b   : > { %p10_p4 = scmp.ge.s32.totalorder %s13_s12, 6  }
 0x13d   :  { %12 = sbr.rel (!%p10_p4) target bundleno = 1 (0x1), region = 62 }

</bundles_post_ra>
